<compile_context>
chip_gen: v7x
topology: tpu7x:2x2x1
jax: 0.10.0
libtpu: 0.0.40
codegen_flags: <defaults>
</compile_context>

<pallas_src>
import functools

import jax
import jax.numpy as jnp
from jax import lax
from jax.experimental import pallas as pl
from jax.experimental.pallas import tpu as pltpu


def _pick_tile(hw, target, sublane):
    """Largest tile <= target that divides HW and is sublane-pack aligned."""
    t = min(hw, target)
    start = t - (t % sublane)
    for cand in range(start, 0, -sublane):
        if hw % cand == 0:
            return cand
    return hw  # full-extent block is always legal


def _vmem_bytes_estimate(tq, tk, c, c_v, n_heads, in_itemsize, dot_itemsize):
    """Rough scoped-VMEM need: double-buffered tiles + scratch + transients."""
    lane = lambda n: -(-n // 128) * 128
    sub = lambda n: -(-n // 8) * 8
    est = 0
    est += 2 * sub(tq) * lane(c) * in_itemsize       # q tile, double-buffered
    est += 2 * sub(tk) * lane(c) * in_itemsize       # k tile
    est += 2 * sub(tk) * lane(c_v) * in_itemsize     # v tile
    est += 2 * sub(tq) * lane(c_v) * in_itemsize     # out tile
    est += sub(tq) * lane(c) * dot_itemsize          # cached q scratch
    est += 3 * n_heads * sub(tq) * 128 * 4           # m, l, acc (lane padded)
    est += 4 * sub(tq) * lane(tk) * 4                # f32 (tq, tk) transients
    return est


def _spatial_attention_kernel(n_heads, d, dv, dot_dtype, exp_dtype, approx_recip,
                              q_ref, k_ref, v_ref, w_qk_ref, w_vp_ref,
                              o_ref,
                              q_scr, m_scr, l_scr, acc_scr):
    kv_idx = pl.program_id(2)

    # Packed depthwise-conv params: w_qk rows = [wq*scale, bq*scale, wk, bk],
    # w_vp rows = [wv, bv, wp, bp].
    wqk = w_qk_ref[...]          # (4, C)
    wvp = w_vp_ref[...]          # (4, Cv)

    @pl.when(kv_idx == 0)
    def _init():
        # q affine + cast is invariant along the KV grid axis: do it once per
        # q tile and cache in VMEM (Pallas already skips the re-DMA of q).
        qf = q_ref[0].astype(jnp.float32) * wqk[0:1] + wqk[1:2]   # (tq, C)
        q_scr[...] = qf.astype(dot_dtype)
        m_scr[...] = jnp.full_like(m_scr, -jnp.inf)
        l_scr[...] = jnp.zeros_like(l_scr)
        acc_scr[...] = jnp.zeros_like(acc_scr)

    q = q_scr[...]                                                 # (tq, C)
    k = (k_ref[0].astype(jnp.float32) * wqk[2:3] + wqk[3:4]).astype(dot_dtype)
    v = (v_ref[0].astype(jnp.float32) * wvp[0:1] + wvp[1:2]).astype(dot_dtype)

    # Per-head (block-diagonal) flash-attention update; heads unrolled so the
    # MXU gets several back-to-back tiny matmuls within a single grid step.
    for h in range(n_heads):
        qh = q[:, h * d:(h + 1) * d]          # (tq, d)
        kh = k[:, h * d:(h + 1) * d]          # (tk, d)
        vh = v[:, h * dv:(h + 1) * dv]        # (tk, dv)

        # Contract on the last dim of BOTH operands: no K transpose.
        s = lax.dot_general(qh, kh, (((1,), (1,)), ((), ())),
                            preferred_element_type=jnp.float32)    # (tq, tk)

        m_prev = m_scr[h]                                           # (tq, 1)
        m_new = jnp.maximum(m_prev, jnp.max(s, axis=-1, keepdims=True))
        alpha = jnp.exp(m_prev - m_new)                             # f32 stats
        p = jnp.exp((s - m_new).astype(exp_dtype))                  # (tq, tk)

        l_scr[h] = alpha * l_scr[h] + jnp.sum(
            p.astype(jnp.float32), axis=-1, keepdims=True)
        acc_scr[h] = alpha * acc_scr[h] + jnp.dot(
            p.astype(dot_dtype), vh, preferred_element_type=jnp.float32)
        m_scr[h] = m_new

    # Deferred softmax normalization + output depthwise projection, written as
    # ONE lane-dense (tq, Cv) slab on the final KV step.
    @pl.when(kv_idx == pl.num_programs(2) - 1)
    def _finalize():
        outs = [acc_scr[h] * pl.reciprocal(l_scr[h], approx=approx_recip)
                for h in range(n_heads)]
        out = jnp.concatenate(outs, axis=-1)                        # (tq, Cv)
        out = out * wvp[2:3] + wvp[3:4]
        o_ref[0] = out.astype(o_ref.dtype)


def spatial_attention(x, params, n_heads=4, *, block_q=512, block_kv=256,
                      dot_dtype=None, exp_dtype=None, approx_reciprocal=False):
    """x = (q, k, v): q,k (B, HW, C_in), v (B, HW, C_out). Returns (B, HW, C_out).

    dot_dtype: dtype fed to the MXU. bf16 is recommended on ALL chips (v5e's
               MXU is bf16-native too); softmax statistics always stay f32.
    exp_dtype: dtype for the (tq, tk) exp. bf16 roughly doubles EUP throughput
               on v6e/v7x (NOT v5e, f32-only EUP). Defaults to f32.
    approx_reciprocal: use the EUP approximate reciprocal for 1/l.
    Precision note: bf16 dot/exp and approx_reciprocal loosen tolerances past
    1e-4 vs. the f32 reference by design.
    """
    q_in, k_in, v_in = x
    b, hw, c = q_in.shape
    c_v = v_in.shape[2]
    assert c % n_heads == 0 and c_v % n_heads == 0
    d = c // n_heads
    dv = c_v // n_heads
    scale = float(d) ** (-0.5)

    if dot_dtype is None:
        dot_dtype = q_in.dtype
    if exp_dtype is None:
        exp_dtype = jnp.float32

    in_itemsize = jnp.dtype(q_in.dtype).itemsize
    dot_itemsize = jnp.dtype(dot_dtype).itemsize
    sublane = 8 * (4 // min(in_itemsize, dot_itemsize, 4))

    tq = _pick_tile(hw, block_q, sublane)
    tk = _pick_tile(hw, block_kv, sublane)

    # v7x has 2 TensorCores: keep the parallel grid extent >= 2 when possible.
    if b * (hw // tq) < 2:
        half = _pick_tile(hw, max(tq // 2, sublane), sublane)
        if hw // half >= 2:
            tq = half

    # Depthwise-conv params packed into two stacked arrays; the softmax scale
    # is folded into q's affine (wrapper-side constant fold on O(C) vectors).
    f32 = jnp.float32
    w_qk = jnp.stack([
        params["wq"].astype(f32) * scale,
        params["bq"].astype(f32) * scale,
        params["wk"].astype(f32),
        params["bk"].astype(f32),
    ], axis=0)                                                     # (4, C)
    w_vp = jnp.stack([
        params["wv"].astype(f32),
        params["bv"].astype(f32),
        params["wp"].astype(f32),
        params["bp"].astype(f32),
    ], axis=0)                                                     # (4, Cv)

    q_spec = pl.BlockSpec((1, tq, c), lambda bi, qi, ki: (bi, qi, 0))
    k_spec = pl.BlockSpec((1, tk, c), lambda bi, qi, ki: (bi, ki, 0))
    v_spec = pl.BlockSpec((1, tk, c_v), lambda bi, qi, ki: (bi, ki, 0))
    wqk_spec = pl.BlockSpec((4, c), lambda bi, qi, ki: (0, 0))
    wvp_spec = pl.BlockSpec((4, c_v), lambda bi, qi, ki: (0, 0))
    o_spec = pl.BlockSpec((1, tq, c_v), lambda bi, qi, ki: (bi, qi, 0))

    vmem_limit = min(
        max(int(1.5 * _vmem_bytes_estimate(tq, tk, c, c_v, n_heads,
                                           in_itemsize, dot_itemsize)),
            32 << 20),
        64 << 20)   # <= v7x physical VMEM; default scoped limits are 16/32 MiB

    kernel = functools.partial(_spatial_attention_kernel, n_heads, d, dv,
                               dot_dtype, exp_dtype, approx_reciprocal)

    out = pl.pallas_call(
        kernel,
        out_shape=jax.ShapeDtypeStruct((b, hw, c_v), q_in.dtype),
        grid_spec=pltpu.PrefetchScalarGridSpec(
            num_scalar_prefetch=0,
            grid=(b, hw // tq, hw // tk),          # KV axis last (reduction)
            in_specs=[q_spec, k_spec, v_spec, wqk_spec, wvp_spec],
            out_specs=o_spec,
            scratch_shapes=[
                pltpu.VMEM((tq, c), dot_dtype),              # cached q tile
                pltpu.VMEM((n_heads, tq, 1), jnp.float32),   # running max m
                pltpu.VMEM((n_heads, tq, 1), jnp.float32),   # running sum l
                pltpu.VMEM((n_heads, tq, dv), jnp.float32),  # f32 accumulator
            ]),
        compiler_params=pltpu.CompilerParams(
            dimension_semantics=("parallel", "parallel", "arbitrary"),
            vmem_limit_bytes=vmem_limit),
    )(q_in, k_in, v_in, w_qk, w_vp)

    return out


def spatial_attention_ref(x, params, n_heads=4):
    """Pure-JAX reference mirroring the PyTorch SpatialAttention.forward."""
    q_in, k_in, v_in = x
    q = q_in * params["wq"] + params["bq"]
    k = k_in * params["wk"] + params["bk"]
    v = v_in * params["wv"] + params["bv"]
    b, hw, c = q.shape
    c_v = v.shape[2]
    d, dv = c // n_heads, c_v // n_heads
    scale = d ** (-0.5)
    q = q.reshape(b, hw, n_heads, d).transpose(0, 2, 1, 3)
    k = k.reshape(b, hw, n_heads, d).transpose(0, 2, 1, 3)
    v = v.reshape(b, hw, n_heads, dv).transpose(0, 2, 1, 3)
    s = jnp.einsum('bhqd,bhkd->bhqk', q, k) * scale
    att = jax.nn.softmax(s, axis=-1)
    o = jnp.einsum('bhqk,bhkd->bhqd', att, v)
    o = o.transpose(0, 2, 1, 3).reshape(b, hw, c_v)
    return o * params["wp"] + params["bp"]


if __name__ == "__main__":
    # Small, module-consistent shapes: q/k channels = sum(features) = 16,
    # v/out channels = 8, 4 heads, HW = 64 (8x8 patch grid), batch = 2.
    B, HW, C_IN, C_OUT, N_HEADS = 2, 64, 16, 8, 4

    key = jax.random.PRNGKey(0)
    (kq, kk, kv, kwq, kbq, kwk, kbk, kwv, kbv, kwp, kbp) = jax.random.split(key, 11)

    q = jax.random.normal(kq, (B, HW, C_IN), jnp.float32)
    k = jax.random.normal(kk, (B, HW, C_IN), jnp.float32)
    v = jax.random.normal(kv, (B, HW, C_OUT), jnp.float32)

    params = {
        "wq": jax.random.normal(kwq, (C_IN,), jnp.float32) * 0.5,
        "bq": jax.random.normal(kbq, (C_IN,), jnp.float32) * 0.1,
        "wk": jax.random.normal(kwk, (C_IN,), jnp.float32) * 0.5,
        "bk": jax.random.normal(kbk, (C_IN,), jnp.float32) * 0.1,
        "wv": jax.random.normal(kwv, (C_OUT,), jnp.float32) * 0.5,
        "bv": jax.random.normal(kbv, (C_OUT,), jnp.float32) * 0.1,
        "wp": jax.random.normal(kwp, (C_OUT,), jnp.float32) * 0.5,
        "bp": jax.random.normal(kbp, (C_OUT,), jnp.float32) * 0.1,
    }

    inputs = (q, k, v)
    # block_q/block_kv = 32 -> 2x2 q/kv tiles, exercising the q-tile cache and
    # the online-softmax accumulation across KV grid steps.
    out = spatial_attention(inputs, params, n_heads=N_HEADS,
                            block_q=32, block_kv=32)
    out = jax.block_until_ready(out)

    ref = spatial_attention_ref(inputs, params, n_heads=N_HEADS)
    assert out.shape == (B, HW, C_OUT), out.shape
    max_err = float(jnp.max(jnp.abs(out - ref)))
    assert jnp.allclose(out, ref, atol=1e-4, rtol=1e-4), max_err

    # Also exercise the large default tiles (single KV step) path.
    out2 = jax.block_until_ready(
        spatial_attention(inputs, params, n_heads=N_HEADS))
    assert jnp.allclose(out2, ref, atol=1e-4, rtol=1e-4)

    print("KERNEL_OK")
</pallas_src>

<mosaic_0001>
module attributes {stable_mosaic.version = 11 : i64} {
  func.func @_spatial_attention_kernel(%arg0: i32, %arg1: i32, %arg2: i32, %arg3: memref<1x32x16xf32, #tpu.memory_space<vmem>>, %arg4: memref<1x32x16xf32, #tpu.memory_space<vmem>>, %arg5: memref<1x32x8xf32, #tpu.memory_space<vmem>>, %arg6: memref<4x16xf32, #tpu.memory_space<vmem>>, %arg7: memref<4x8xf32, #tpu.memory_space<vmem>>, %arg8: memref<1x32x8xf32, #tpu.memory_space<vmem>>, %arg9: memref<32x16xf32, #tpu.memory_space<vmem>>, %arg10: memref<4x32x1xf32, #tpu.memory_space<vmem>>, %arg11: memref<4x32x1xf32, #tpu.memory_space<vmem>>, %arg12: memref<4x32x2xf32, #tpu.memory_space<vmem>>) attributes {dimension_semantics = [#tpu.dimension_semantics<parallel>, #tpu.dimension_semantics<parallel>, #tpu.dimension_semantics<arbitrary>], iteration_bounds = array<i64: 2, 2, 2>, scalar_prefetch = 0 : i64, scratch_operands = 4 : i64, tpu.core_type = #tpu.core_type<tc>, window_params = [{transform_indices = @transform_0, window_bounds = array<i64: 1, 32, 16>}, {transform_indices = @transform_1, window_bounds = array<i64: 1, 32, 16>}, {transform_indices = @transform_2, window_bounds = array<i64: 1, 32, 8>}, {pipeline_mode = #tpu.pipeline_mode<synchronous>, transform_indices = @transform_3, window_bounds = array<i64: 4, 16>}, {pipeline_mode = #tpu.pipeline_mode<synchronous>, transform_indices = @transform_4, window_bounds = array<i64: 4, 8>}, {transform_indices = @transform_5, window_bounds = array<i64: 1, 32, 8>}]} {
    %c0 = arith.constant 0 : index
    %c0_0 = arith.constant 0 : index
    %0 = vector.load %arg6[%c0, %c0_0] : memref<4x16xf32, #tpu.memory_space<vmem>>, vector<4x16xf32>
    %c0_1 = arith.constant 0 : index
    %c0_2 = arith.constant 0 : index
    %1 = vector.load %arg7[%c0_1, %c0_2] : memref<4x8xf32, #tpu.memory_space<vmem>>, vector<4x8xf32>
    %c0_i32 = arith.constant 0 : i32
    %2 = arith.cmpi eq, %arg2, %c0_i32 : i32
    %3 = arith.extui %2 : i1 to i32
    %c0_i32_3 = arith.constant 0 : i32
    %4 = arith.cmpi ne, %3, %c0_i32_3 : i32
    scf.if %4 {
      %c0_97 = arith.constant 0 : index
      %c0_98 = arith.constant 0 : index
      %c0_99 = arith.constant 0 : index
      %165 = vector.load %arg3[%c0_97, %c0_98, %c0_99] : memref<1x32x16xf32, #tpu.memory_space<vmem>>, vector<1x32x16xf32>
      %166 = vector.shape_cast %165 : vector<1x32x16xf32> to vector<32x16xf32>
      %167 = vector.extract_strided_slice %0 {offsets = [0, 0], sizes = [1, 16], strides = [1, 1]} : vector<4x16xf32> to vector<1x16xf32>
      %168 = vector.broadcast %167 : vector<1x16xf32> to vector<32x16xf32>
      %169 = arith.mulf %166, %168 : vector<32x16xf32>
      %170 = vector.extract_strided_slice %0 {offsets = [1, 0], sizes = [1, 16], strides = [1, 1]} : vector<4x16xf32> to vector<1x16xf32>
      %171 = vector.broadcast %170 : vector<1x16xf32> to vector<32x16xf32>
      %172 = arith.addf %169, %171 : vector<32x16xf32>
      %c0_100 = arith.constant 0 : index
      %c0_101 = arith.constant 0 : index
      %173 = vector.load %arg9[%c0_100, %c0_101] : memref<32x16xf32, #tpu.memory_space<vmem>>, vector<32x16xf32>
      tpu.vector_store %arg9[%c0_100, %c0_101], %172 {strides = array<i32>} : memref<32x16xf32, #tpu.memory_space<vmem>>, vector<32x16xf32>,
      %cst_102 = arith.constant 0xFF800000 : f32
      %174 = vector.broadcast %cst_102 : f32 to vector<4x32x1xf32>
      %c0_103 = arith.constant 0 : index
      %c0_104 = arith.constant 0 : index
      %c0_105 = arith.constant 0 : index
      %175 = vector.load %arg10[%c0_103, %c0_104, %c0_105] : memref<4x32x1xf32, #tpu.memory_space<vmem>>, vector<4x32x1xf32>
      tpu.vector_store %arg10[%c0_103, %c0_104, %c0_105], %174 {strides = array<i32>} : memref<4x32x1xf32, #tpu.memory_space<vmem>>, vector<4x32x1xf32>,
      %cst_106 = arith.constant 0.000000e+00 : f32
      %176 = vector.broadcast %cst_106 : f32 to vector<4x32x1xf32>
      %c0_107 = arith.constant 0 : index
      %c0_108 = arith.constant 0 : index
      %c0_109 = arith.constant 0 : index
      %177 = vector.load %arg11[%c0_107, %c0_108, %c0_109] : memref<4x32x1xf32, #tpu.memory_space<vmem>>, vector<4x32x1xf32>
      tpu.vector_store %arg11[%c0_107, %c0_108, %c0_109], %176 {strides = array<i32>} : memref<4x32x1xf32, #tpu.memory_space<vmem>>, vector<4x32x1xf32>,
      %cst_110 = arith.constant 0.000000e+00 : f32
      %178 = vector.broadcast %cst_110 : f32 to vector<4x32x2xf32>
      %c0_111 = arith.constant 0 : index
      %c0_112 = arith.constant 0 : index
      %c0_113 = arith.constant 0 : index
      %179 = vector.load %arg12[%c0_111, %c0_112, %c0_113] : memref<4x32x2xf32, #tpu.memory_space<vmem>>, vector<4x32x2xf32>
      tpu.vector_store %arg12[%c0_111, %c0_112, %c0_113], %178 {strides = array<i32>} : memref<4x32x2xf32, #tpu.memory_space<vmem>>, vector<4x32x2xf32>,
    } else {
    }
    %c0_4 = arith.constant 0 : index
    %c0_5 = arith.constant 0 : index
    %5 = vector.load %arg9[%c0_4, %c0_5] : memref<32x16xf32, #tpu.memory_space<vmem>>, vector<32x16xf32>
    %c0_6 = arith.constant 0 : index
    %c0_7 = arith.constant 0 : index
    %c0_8 = arith.constant 0 : index
    %6 = vector.load %arg4[%c0_6, %c0_7, %c0_8] : memref<1x32x16xf32, #tpu.memory_space<vmem>>, vector<1x32x16xf32>
    %7 = vector.shape_cast %6 : vector<1x32x16xf32> to vector<32x16xf32>
    %8 = vector.extract_strided_slice %0 {offsets = [2, 0], sizes = [1, 16], strides = [1, 1]} : vector<4x16xf32> to vector<1x16xf32>
    %9 = vector.broadcast %8 : vector<1x16xf32> to vector<32x16xf32>
    %10 = arith.mulf %7, %9 : vector<32x16xf32>
    %11 = vector.extract_strided_slice %0 {offsets = [3, 0], sizes = [1, 16], strides = [1, 1]} : vector<4x16xf32> to vector<1x16xf32>
    %12 = vector.broadcast %11 : vector<1x16xf32> to vector<32x16xf32>
    %13 = arith.addf %10, %12 : vector<32x16xf32>
    %c0_9 = arith.constant 0 : index
    %c0_10 = arith.constant 0 : index
    %c0_11 = arith.constant 0 : index
    %14 = vector.load %arg5[%c0_9, %c0_10, %c0_11] : memref<1x32x8xf32, #tpu.memory_space<vmem>>, vector<1x32x8xf32>
    %15 = vector.shape_cast %14 : vector<1x32x8xf32> to vector<32x8xf32>
    %16 = vector.extract_strided_slice %1 {offsets = [0, 0], sizes = [1, 8], strides = [1, 1]} : vector<4x8xf32> to vector<1x8xf32>
    %17 = vector.broadcast %16 : vector<1x8xf32> to vector<32x8xf32>
    %18 = arith.mulf %15, %17 : vector<32x8xf32>
    %19 = vector.extract_strided_slice %1 {offsets = [1, 0], sizes = [1, 8], strides = [1, 1]} : vector<4x8xf32> to vector<1x8xf32>
    %20 = vector.broadcast %19 : vector<1x8xf32> to vector<32x8xf32>
    %21 = arith.addf %18, %20 : vector<32x8xf32>
    %22 = vector.extract_strided_slice %5 {offsets = [0, 0], sizes = [32, 4], strides = [1, 1]} : vector<32x16xf32> to vector<32x4xf32>
    %23 = vector.extract_strided_slice %13 {offsets = [0, 0], sizes = [32, 4], strides = [1, 1]} : vector<32x16xf32> to vector<32x4xf32>
    %24 = vector.extract_strided_slice %21 {offsets = [0, 0], sizes = [32, 2], strides = [1, 1]} : vector<32x8xf32> to vector<32x2xf32>
    %cst = arith.constant dense<0.000000e+00> : vector<32x32xf32>
    %25 = tpu.matmul %22, %23, %cst {dimension_numbers = #tpu.dot_dimension_numbers<[1], [1], [0], [0], [0, 0, 1, 0], [], []>} : vector<32x4xf32>, vector<32x4xf32>, vector<32x32xf32> -> vector<32x32xf32>
    %c0_12 = arith.constant 0 : index
    %c0_13 = arith.constant 0 : index
    %c0_14 = arith.constant 0 : index
    %26 = vector.load %arg10[%c0_12, %c0_13, %c0_14] : memref<4x32x1xf32, #tpu.memory_space<vmem>>, vector<1x32x1xf32>
    %27 = vector.shape_cast %26 : vector<1x32x1xf32> to vector<32x1xf32>
    %cst_15 = arith.constant dense<0xFF800000> : vector<32xf32>
    %28 = vector.multi_reduction <maximumf>, %25, %cst_15 [1] : vector<32x32xf32> to vector<32xf32>
    %29 = vector.shape_cast %28 : vector<32xf32> to vector<32x1xf32>
    %30 = arith.maximumf %27, %29 : vector<32x1xf32>
    %31 = arith.subf %27, %30 : vector<32x1xf32>
    %32 = math.exp %31 : vector<32x1xf32>
    %33 = vector.broadcast %30 : vector<32x1xf32> to vector<32x32xf32>
    %34 = arith.subf %25, %33 : vector<32x32xf32>
    %35 = math.exp %34 : vector<32x32xf32>
    %c0_16 = arith.constant 0 : index
    %c0_17 = arith.constant 0 : index
    %c0_18 = arith.constant 0 : index
    %36 = vector.load %arg11[%c0_16, %c0_17, %c0_18] : memref<4x32x1xf32, #tpu.memory_space<vmem>>, vector<1x32x1xf32>
    %37 = vector.shape_cast %36 : vector<1x32x1xf32> to vector<32x1xf32>
    %38 = arith.mulf %32, %37 : vector<32x1xf32>
    %cst_19 = arith.constant dense<0.000000e+00> : vector<32xf32>
    %39 = vector.multi_reduction <add>, %35, %cst_19 [1] : vector<32x32xf32> to vector<32xf32>
    %40 = vector.shape_cast %39 : vector<32xf32> to vector<32x1xf32>
    %41 = arith.addf %38, %40 : vector<32x1xf32>
    %c0_20 = arith.constant 0 : index
    %c0_21 = arith.constant 0 : index
    %c0_22 = arith.constant 0 : index
    %42 = vector.load %arg11[%c0_20, %c0_21, %c0_22] : memref<4x32x1xf32, #tpu.memory_space<vmem>>, vector<1x32x1xf32>
    %43 = vector.shape_cast %42 : vector<1x32x1xf32> to vector<32x1xf32>
    %44 = vector.shape_cast %41 : vector<32x1xf32> to vector<1x32x1xf32>
    tpu.vector_store %arg11[%c0_20, %c0_21, %c0_22], %44 {strides = array<i32>} : memref<4x32x1xf32, #tpu.memory_space<vmem>>, vector<1x32x1xf32>,
    %c0_23 = arith.constant 0 : index
    %c0_24 = arith.constant 0 : index
    %c0_25 = arith.constant 0 : index
    %45 = vector.load %arg12[%c0_23, %c0_24, %c0_25] : memref<4x32x2xf32, #tpu.memory_space<vmem>>, vector<1x32x2xf32>
    %46 = vector.shape_cast %45 : vector<1x32x2xf32> to vector<32x2xf32>
    %47 = vector.broadcast %32 : vector<32x1xf32> to vector<32x2xf32>
    %48 = arith.mulf %47, %46 : vector<32x2xf32>
    %cst_26 = arith.constant dense<0.000000e+00> : vector<32x2xf32>
    %49 = tpu.matmul %35, %24, %cst_26 {dimension_numbers = #tpu.dot_dimension_numbers<[1], [0], [0], [1], [0, 0, 1, 1], [], []>} : vector<32x32xf32>, vector<32x2xf32>, vector<32x2xf32> -> vector<32x2xf32>
    %50 = arith.addf %48, %49 : vector<32x2xf32>
    %c0_27 = arith.constant 0 : index
    %c0_28 = arith.constant 0 : index
    %c0_29 = arith.constant 0 : index
    %51 = vector.load %arg12[%c0_27, %c0_28, %c0_29] : memref<4x32x2xf32, #tpu.memory_space<vmem>>, vector<1x32x2xf32>
    %52 = vector.shape_cast %51 : vector<1x32x2xf32> to vector<32x2xf32>
    %53 = vector.shape_cast %50 : vector<32x2xf32> to vector<1x32x2xf32>
    tpu.vector_store %arg12[%c0_27, %c0_28, %c0_29], %53 {strides = array<i32>} : memref<4x32x2xf32, #tpu.memory_space<vmem>>, vector<1x32x2xf32>,
    %c0_30 = arith.constant 0 : index
    %c0_31 = arith.constant 0 : index
    %c0_32 = arith.constant 0 : index
    %54 = vector.load %arg10[%c0_30, %c0_31, %c0_32] : memref<4x32x1xf32, #tpu.memory_space<vmem>>, vector<1x32x1xf32>
    %55 = vector.shape_cast %54 : vector<1x32x1xf32> to vector<32x1xf32>
    %56 = vector.shape_cast %30 : vector<32x1xf32> to vector<1x32x1xf32>
    tpu.vector_store %arg10[%c0_30, %c0_31, %c0_32], %56 {strides = array<i32>} : memref<4x32x1xf32, #tpu.memory_space<vmem>>, vector<1x32x1xf32>,
    %57 = vector.extract_strided_slice %5 {offsets = [0, 4], sizes = [32, 4], strides = [1, 1]} : vector<32x16xf32> to vector<32x4xf32>
    %58 = vector.extract_strided_slice %13 {offsets = [0, 4], sizes = [32, 4], strides = [1, 1]} : vector<32x16xf32> to vector<32x4xf32>
    %59 = vector.extract_strided_slice %21 {offsets = [0, 2], sizes = [32, 2], strides = [1, 1]} : vector<32x8xf32> to vector<32x2xf32>
    %cst_33 = arith.constant dense<0.000000e+00> : vector<32x32xf32>
    %60 = tpu.matmul %57, %58, %cst_33 {dimension_numbers = #tpu.dot_dimension_numbers<[1], [1], [0], [0], [0, 0, 1, 0], [], []>} : vector<32x4xf32>, vector<32x4xf32>, vector<32x32xf32> -> vector<32x32xf32>
    %c1 = arith.constant 1 : index
    %c0_34 = arith.constant 0 : index
    %c0_35 = arith.constant 0 : index
    %61 = vector.load %arg10[%c1, %c0_34, %c0_35] : memref<4x32x1xf32, #tpu.memory_space<vmem>>, vector<1x32x1xf32>
    %62 = vector.shape_cast %61 : vector<1x32x1xf32> to vector<32x1xf32>
    %cst_36 = arith.constant dense<0xFF800000> : vector<32xf32>
    %63 = vector.multi_reduction <maximumf>, %60, %cst_36 [1] : vector<32x32xf32> to vector<32xf32>
    %64 = vector.shape_cast %63 : vector<32xf32> to vector<32x1xf32>
    %65 = arith.maximumf %62, %64 : vector<32x1xf32>
    %66 = arith.subf %62, %65 : vector<32x1xf32>
    %67 = math.exp %66 : vector<32x1xf32>
    %68 = vector.broadcast %65 : vector<32x1xf32> to vector<32x32xf32>
    %69 = arith.subf %60, %68 : vector<32x32xf32>
    %70 = math.exp %69 : vector<32x32xf32>
    %c1_37 = arith.constant 1 : index
    %c0_38 = arith.constant 0 : index
    %c0_39 = arith.constant 0 : index
    %71 = vector.load %arg11[%c1_37, %c0_38, %c0_39] : memref<4x32x1xf32, #tpu.memory_space<vmem>>, vector<1x32x1xf32>
    %72 = vector.shape_cast %71 : vector<1x32x1xf32> to vector<32x1xf32>
    %73 = arith.mulf %67, %72 : vector<32x1xf32>
    %cst_40 = arith.constant dense<0.000000e+00> : vector<32xf32>
    %74 = vector.multi_reduction <add>, %70, %cst_40 [1] : vector<32x32xf32> to vector<32xf32>
    %75 = vector.shape_cast %74 : vector<32xf32> to vector<32x1xf32>
    %76 = arith.addf %73, %75 : vector<32x1xf32>
    %c1_41 = arith.constant 1 : index
    %c0_42 = arith.constant 0 : index
    %c0_43 = arith.constant 0 : index
    %77 = vector.load %arg11[%c1_41, %c0_42, %c0_43] : memref<4x32x1xf32, #tpu.memory_space<vmem>>, vector<1x32x1xf32>
    %78 = vector.shape_cast %77 : vector<1x32x1xf32> to vector<32x1xf32>
    %79 = vector.shape_cast %76 : vector<32x1xf32> to vector<1x32x1xf32>
    tpu.vector_store %arg11[%c1_41, %c0_42, %c0_43], %79 {strides = array<i32>} : memref<4x32x1xf32, #tpu.memory_space<vmem>>, vector<1x32x1xf32>,
    %c1_44 = arith.constant 1 : index
    %c0_45 = arith.constant 0 : index
    %c0_46 = arith.constant 0 : index
    %80 = vector.load %arg12[%c1_44, %c0_45, %c0_46] : memref<4x32x2xf32, #tpu.memory_space<vmem>>, vector<1x32x2xf32>
    %81 = vector.shape_cast %80 : vector<1x32x2xf32> to vector<32x2xf32>
    %82 = vector.broadcast %67 : vector<32x1xf32> to vector<32x2xf32>
    %83 = arith.mulf %82, %81 : vector<32x2xf32>
    %cst_47 = arith.constant dense<0.000000e+00> : vector<32x2xf32>
    %84 = tpu.matmul %70, %59, %cst_47 {dimension_numbers = #tpu.dot_dimension_numbers<[1], [0], [0], [1], [0, 0, 1, 1], [], []>} : vector<32x32xf32>, vector<32x2xf32>, vector<32x2xf32> -> vector<32x2xf32>
    %85 = arith.addf %83, %84 : vector<32x2xf32>
    %c1_48 = arith.constant 1 : index
    %c0_49 = arith.constant 0 : index
    %c0_50 = arith.constant 0 : index
    %86 = vector.load %arg12[%c1_48, %c0_49, %c0_50] : memref<4x32x2xf32, #tpu.memory_space<vmem>>, vector<1x32x2xf32>
    %87 = vector.shape_cast %86 : vector<1x32x2xf32> to vector<32x2xf32>
    %88 = vector.shape_cast %85 : vector<32x2xf32> to vector<1x32x2xf32>
    tpu.vector_store %arg12[%c1_48, %c0_49, %c0_50], %88 {strides = array<i32>} : memref<4x32x2xf32, #tpu.memory_space<vmem>>, vector<1x32x2xf32>,
    %c1_51 = arith.constant 1 : index
    %c0_52 = arith.constant 0 : index
    %c0_53 = arith.constant 0 : index
    %89 = vector.load %arg10[%c1_51, %c0_52, %c0_53] : memref<4x32x1xf32, #tpu.memory_space<vmem>>, vector<1x32x1xf32>
    %90 = vector.shape_cast %89 : vector<1x32x1xf32> to vector<32x1xf32>
    %91 = vector.shape_cast %65 : vector<32x1xf32> to vector<1x32x1xf32>
    tpu.vector_store %arg10[%c1_51, %c0_52, %c0_53], %91 {strides = array<i32>} : memref<4x32x1xf32, #tpu.memory_space<vmem>>, vector<1x32x1xf32>,
    %92 = vector.extract_strided_slice %5 {offsets = [0, 8], sizes = [32, 4], strides = [1, 1]} : vector<32x16xf32> to vector<32x4xf32>
    %93 = vector.extract_strided_slice %13 {offsets = [0, 8], sizes = [32, 4], strides = [1, 1]} : vector<32x16xf32> to vector<32x4xf32>
    %94 = vector.extract_strided_slice %21 {offsets = [0, 4], sizes = [32, 2], strides = [1, 1]} : vector<32x8xf32> to vector<32x2xf32>
    %cst_54 = arith.constant dense<0.000000e+00> : vector<32x32xf32>
    %95 = tpu.matmul %92, %93, %cst_54 {dimension_numbers = #tpu.dot_dimension_numbers<[1], [1], [0], [0], [0, 0, 1, 0], [], []>} : vector<32x4xf32>, vector<32x4xf32>, vector<32x32xf32> -> vector<32x32xf32>
    %c2 = arith.constant 2 : index
    %c0_55 = arith.constant 0 : index
    %c0_56 = arith.constant 0 : index
    %96 = vector.load %arg10[%c2, %c0_55, %c0_56] : memref<4x32x1xf32, #tpu.memory_space<vmem>>, vector<1x32x1xf32>
    %97 = vector.shape_cast %96 : vector<1x32x1xf32> to vector<32x1xf32>
    %cst_57 = arith.constant dense<0xFF800000> : vector<32xf32>
    %98 = vector.multi_reduction <maximumf>, %95, %cst_57 [1] : vector<32x32xf32> to vector<32xf32>
    %99 = vector.shape_cast %98 : vector<32xf32> to vector<32x1xf32>
    %100 = arith.maximumf %97, %99 : vector<32x1xf32>
    %101 = arith.subf %97, %100 : vector<32x1xf32>
    %102 = math.exp %101 : vector<32x1xf32>
    %103 = vector.broadcast %100 : vector<32x1xf32> to vector<32x32xf32>
    %104 = arith.subf %95, %103 : vector<32x32xf32>
    %105 = math.exp %104 : vector<32x32xf32>
    %c2_58 = arith.constant 2 : index
    %c0_59 = arith.constant 0 : index
    %c0_60 = arith.constant 0 : index
    %106 = vector.load %arg11[%c2_58, %c0_59, %c0_60] : memref<4x32x1xf32, #tpu.memory_space<vmem>>, vector<1x32x1xf32>
    %107 = vector.shape_cast %106 : vector<1x32x1xf32> to vector<32x1xf32>
    %108 = arith.mulf %102, %107 : vector<32x1xf32>
    %cst_61 = arith.constant dense<0.000000e+00> : vector<32xf32>
    %109 = vector.multi_reduction <add>, %105, %cst_61 [1] : vector<32x32xf32> to vector<32xf32>
    %110 = vector.shape_cast %109 : vector<32xf32> to vector<32x1xf32>
    %111 = arith.addf %108, %110 : vector<32x1xf32>
    %c2_62 = arith.constant 2 : index
    %c0_63 = arith.constant 0 : index
    %c0_64 = arith.constant 0 : index
    %112 = vector.load %arg11[%c2_62, %c0_63, %c0_64] : memref<4x32x1xf32, #tpu.memory_space<vmem>>, vector<1x32x1xf32>
    %113 = vector.shape_cast %112 : vector<1x32x1xf32> to vector<32x1xf32>
    %114 = vector.shape_cast %111 : vector<32x1xf32> to vector<1x32x1xf32>
    tpu.vector_store %arg11[%c2_62, %c0_63, %c0_64], %114 {strides = array<i32>} : memref<4x32x1xf32, #tpu.memory_space<vmem>>, vector<1x32x1xf32>,
    %c2_65 = arith.constant 2 : index
    %c0_66 = arith.constant 0 : index
    %c0_67 = arith.constant 0 : index
    %115 = vector.load %arg12[%c2_65, %c0_66, %c0_67] : memref<4x32x2xf32, #tpu.memory_space<vmem>>, vector<1x32x2xf32>
    %116 = vector.shape_cast %115 : vector<1x32x2xf32> to vector<32x2xf32>
    %117 = vector.broadcast %102 : vector<32x1xf32> to vector<32x2xf32>
    %118 = arith.mulf %117, %116 : vector<32x2xf32>
    %cst_68 = arith.constant dense<0.000000e+00> : vector<32x2xf32>
    %119 = tpu.matmul %105, %94, %cst_68 {dimension_numbers = #tpu.dot_dimension_numbers<[1], [0], [0], [1], [0, 0, 1, 1], [], []>} : vector<32x32xf32>, vector<32x2xf32>, vector<32x2xf32> -> vector<32x2xf32>
    %120 = arith.addf %118, %119 : vector<32x2xf32>
    %c2_69 = arith.constant 2 : index
    %c0_70 = arith.constant 0 : index
    %c0_71 = arith.constant 0 : index
    %121 = vector.load %arg12[%c2_69, %c0_70, %c0_71] : memref<4x32x2xf32, #tpu.memory_space<vmem>>, vector<1x32x2xf32>
    %122 = vector.shape_cast %121 : vector<1x32x2xf32> to vector<32x2xf32>
    %123 = vector.shape_cast %120 : vector<32x2xf32> to vector<1x32x2xf32>
    tpu.vector_store %arg12[%c2_69, %c0_70, %c0_71], %123 {strides = array<i32>} : memref<4x32x2xf32, #tpu.memory_space<vmem>>, vector<1x32x2xf32>,
    %c2_72 = arith.constant 2 : index
    %c0_73 = arith.constant 0 : index
    %c0_74 = arith.constant 0 : index
    %124 = vector.load %arg10[%c2_72, %c0_73, %c0_74] : memref<4x32x1xf32, #tpu.memory_space<vmem>>, vector<1x32x1xf32>
    %125 = vector.shape_cast %124 : vector<1x32x1xf32> to vector<32x1xf32>
    %126 = vector.shape_cast %100 : vector<32x1xf32> to vector<1x32x1xf32>
    tpu.vector_store %arg10[%c2_72, %c0_73, %c0_74], %126 {strides = array<i32>} : memref<4x32x1xf32, #tpu.memory_space<vmem>>, vector<1x32x1xf32>,
    %127 = vector.extract_strided_slice %5 {offsets = [0, 12], sizes = [32, 4], strides = [1, 1]} : vector<32x16xf32> to vector<32x4xf32>
    %128 = vector.extract_strided_slice %13 {offsets = [0, 12], sizes = [32, 4], strides = [1, 1]} : vector<32x16xf32> to vector<32x4xf32>
    %129 = vector.extract_strided_slice %21 {offsets = [0, 6], sizes = [32, 2], strides = [1, 1]} : vector<32x8xf32> to vector<32x2xf32>
    %cst_75 = arith.constant dense<0.000000e+00> : vector<32x32xf32>
    %130 = tpu.matmul %127, %128, %cst_75 {dimension_numbers = #tpu.dot_dimension_numbers<[1], [1], [0], [0], [0, 0, 1, 0], [], []>} : vector<32x4xf32>, vector<32x4xf32>, vector<32x32xf32> -> vector<32x32xf32>
    %c3 = arith.constant 3 : index
    %c0_76 = arith.constant 0 : index
    %c0_77 = arith.constant 0 : index
    %131 = vector.load %arg10[%c3, %c0_76, %c0_77] : memref<4x32x1xf32, #tpu.memory_space<vmem>>, vector<1x32x1xf32>
    %132 = vector.shape_cast %131 : vector<1x32x1xf32> to vector<32x1xf32>
    %cst_78 = arith.constant dense<0xFF800000> : vector<32xf32>
    %133 = vector.multi_reduction <maximumf>, %130, %cst_78 [1] : vector<32x32xf32> to vector<32xf32>
    %134 = vector.shape_cast %133 : vector<32xf32> to vector<32x1xf32>
    %135 = arith.maximumf %132, %134 : vector<32x1xf32>
    %136 = arith.subf %132, %135 : vector<32x1xf32>
    %137 = math.exp %136 : vector<32x1xf32>
    %138 = vector.broadcast %135 : vector<32x1xf32> to vector<32x32xf32>
    %139 = arith.subf %130, %138 : vector<32x32xf32>
    %140 = math.exp %139 : vector<32x32xf32>
    %c3_79 = arith.constant 3 : index
    %c0_80 = arith.constant 0 : index
    %c0_81 = arith.constant 0 : index
    %141 = vector.load %arg11[%c3_79, %c0_80, %c0_81] : memref<4x32x1xf32, #tpu.memory_space<vmem>>, vector<1x32x1xf32>
    %142 = vector.shape_cast %141 : vector<1x32x1xf32> to vector<32x1xf32>
    %143 = arith.mulf %137, %142 : vector<32x1xf32>
    %cst_82 = arith.constant dense<0.000000e+00> : vector<32xf32>
    %144 = vector.multi_reduction <add>, %140, %cst_82 [1] : vector<32x32xf32> to vector<32xf32>
    %145 = vector.shape_cast %144 : vector<32xf32> to vector<32x1xf32>
    %146 = arith.addf %143, %145 : vector<32x1xf32>
    %c3_83 = arith.constant 3 : index
    %c0_84 = arith.constant 0 : index
    %c0_85 = arith.constant 0 : index
    %147 = vector.load %arg11[%c3_83, %c0_84, %c0_85] : memref<4x32x1xf32, #tpu.memory_space<vmem>>, vector<1x32x1xf32>
    %148 = vector.shape_cast %147 : vector<1x32x1xf32> to vector<32x1xf32>
    %149 = vector.shape_cast %146 : vector<32x1xf32> to vector<1x32x1xf32>
    tpu.vector_store %arg11[%c3_83, %c0_84, %c0_85], %149 {strides = array<i32>} : memref<4x32x1xf32, #tpu.memory_space<vmem>>, vector<1x32x1xf32>,
    %c3_86 = arith.constant 3 : index
    %c0_87 = arith.constant 0 : index
    %c0_88 = arith.constant 0 : index
    %150 = vector.load %arg12[%c3_86, %c0_87, %c0_88] : memref<4x32x2xf32, #tpu.memory_space<vmem>>, vector<1x32x2xf32>
    %151 = vector.shape_cast %150 : vector<1x32x2xf32> to vector<32x2xf32>
    %152 = vector.broadcast %137 : vector<32x1xf32> to vector<32x2xf32>
    %153 = arith.mulf %152, %151 : vector<32x2xf32>
    %cst_89 = arith.constant dense<0.000000e+00> : vector<32x2xf32>
    %154 = tpu.matmul %140, %129, %cst_89 {dimension_numbers = #tpu.dot_dimension_numbers<[1], [0], [0], [1], [0, 0, 1, 1], [], []>} : vector<32x32xf32>, vector<32x2xf32>, vector<32x2xf32> -> vector<32x2xf32>
    %155 = arith.addf %153, %154 : vector<32x2xf32>
    %c3_90 = arith.constant 3 : index
    %c0_91 = arith.constant 0 : index
    %c0_92 = arith.constant 0 : index
    %156 = vector.load %arg12[%c3_90, %c0_91, %c0_92] : memref<4x32x2xf32, #tpu.memory_space<vmem>>, vector<1x32x2xf32>
    %157 = vector.shape_cast %156 : vector<1x32x2xf32> to vector<32x2xf32>
    %158 = vector.shape_cast %155 : vector<32x2xf32> to vector<1x32x2xf32>
    tpu.vector_store %arg12[%c3_90, %c0_91, %c0_92], %158 {strides = array<i32>} : memref<4x32x2xf32, #tpu.memory_space<vmem>>, vector<1x32x2xf32>,
    %c3_93 = arith.constant 3 : index
    %c0_94 = arith.constant 0 : index
    %c0_95 = arith.constant 0 : index
    %159 = vector.load %arg10[%c3_93, %c0_94, %c0_95] : memref<4x32x1xf32, #tpu.memory_space<vmem>>, vector<1x32x1xf32>
    %160 = vector.shape_cast %159 : vector<1x32x1xf32> to vector<32x1xf32>
    %161 = vector.shape_cast %135 : vector<32x1xf32> to vector<1x32x1xf32>
    tpu.vector_store %arg10[%c3_93, %c0_94, %c0_95], %161 {strides = array<i32>} : memref<4x32x1xf32, #tpu.memory_space<vmem>>, vector<1x32x1xf32>,
    %c1_i32 = arith.constant 1 : i32
    %162 = arith.cmpi eq, %arg2, %c1_i32 : i32
    %163 = arith.extui %162 : i1 to i32
    %c0_i32_96 = arith.constant 0 : i32
    %164 = arith.cmpi ne, %163, %c0_i32_96 : i32
    scf.if %164 {
      %c0_97 = arith.constant 0 : index
      %c0_98 = arith.constant 0 : index
      %c0_99 = arith.constant 0 : index
      %165 = vector.load %arg12[%c0_97, %c0_98, %c0_99] : memref<4x32x2xf32, #tpu.memory_space<vmem>>, vector<1x32x2xf32>
      %166 = vector.shape_cast %165 : vector<1x32x2xf32> to vector<32x2xf32>
      %c0_100 = arith.constant 0 : index
      %c0_101 = arith.constant 0 : index
      %c0_102 = arith.constant 0 : index
      %167 = vector.load %arg11[%c0_100, %c0_101, %c0_102] : memref<4x32x1xf32, #tpu.memory_space<vmem>>, vector<1x32x1xf32>
      %168 = vector.shape_cast %167 : vector<1x32x1xf32> to vector<32x1xf32>
      %169 = tpu.reciprocal %168 : vector<32x1xf32> -> vector<32x1xf32>
      %170 = vector.broadcast %169 : vector<32x1xf32> to vector<32x2xf32>
      %171 = arith.mulf %166, %170 : vector<32x2xf32>
      %c1_103 = arith.constant 1 : index
      %c0_104 = arith.constant 0 : index
      %c0_105 = arith.constant 0 : index
      %172 = vector.load %arg12[%c1_103, %c0_104, %c0_105] : memref<4x32x2xf32, #tpu.memory_space<vmem>>, vector<1x32x2xf32>
      %173 = vector.shape_cast %172 : vector<1x32x2xf32> to vector<32x2xf32>
      %c1_106 = arith.constant 1 : index
      %c0_107 = arith.constant 0 : index
      %c0_108 = arith.constant 0 : index
      %174 = vector.load %arg11[%c1_106, %c0_107, %c0_108] : memref<4x32x1xf32, #tpu.memory_space<vmem>>, vector<1x32x1xf32>
      %175 = vector.shape_cast %174 : vector<1x32x1xf32> to vector<32x1xf32>
      %176 = tpu.reciprocal %175 : vector<32x1xf32> -> vector<32x1xf32>
      %177 = vector.broadcast %176 : vector<32x1xf32> to vector<32x2xf32>
      %178 = arith.mulf %173, %177 : vector<32x2xf32>
      %c2_109 = arith.constant 2 : index
      %c0_110 = arith.constant 0 : index
      %c0_111 = arith.constant 0 : index
      %179 = vector.load %arg12[%c2_109, %c0_110, %c0_111] : memref<4x32x2xf32, #tpu.memory_space<vmem>>, vector<1x32x2xf32>
      %180 = vector.shape_cast %179 : vector<1x32x2xf32> to vector<32x2xf32>
      %c2_112 = arith.constant 2 : index
      %c0_113 = arith.constant 0 : index
      %c0_114 = arith.constant 0 : index
      %181 = vector.load %arg11[%c2_112, %c0_113, %c0_114] : memref<4x32x1xf32, #tpu.memory_space<vmem>>, vector<1x32x1xf32>
      %182 = vector.shape_cast %181 : vector<1x32x1xf32> to vector<32x1xf32>
      %183 = tpu.reciprocal %182 : vector<32x1xf32> -> vector<32x1xf32>
      %184 = vector.broadcast %183 : vector<32x1xf32> to vector<32x2xf32>
      %185 = arith.mulf %180, %184 : vector<32x2xf32>
      %c3_115 = arith.constant 3 : index
      %c0_116 = arith.constant 0 : index
      %c0_117 = arith.constant 0 : index
      %186 = vector.load %arg12[%c3_115, %c0_116, %c0_117] : memref<4x32x2xf32, #tpu.memory_space<vmem>>, vector<1x32x2xf32>
      %187 = vector.shape_cast %186 : vector<1x32x2xf32> to vector<32x2xf32>
      %c3_118 = arith.constant 3 : index
      %c0_119 = arith.constant 0 : index
      %c0_120 = arith.constant 0 : index
      %188 = vector.load %arg11[%c3_118, %c0_119, %c0_120] : memref<4x32x1xf32, #tpu.memory_space<vmem>>, vector<1x32x1xf32>
      %189 = vector.shape_cast %188 : vector<1x32x1xf32> to vector<32x1xf32>
      %190 = tpu.reciprocal %189 : vector<32x1xf32> -> vector<32x1xf32>
      %191 = vector.broadcast %190 : vector<32x1xf32> to vector<32x2xf32>
      %192 = arith.mulf %187, %191 : vector<32x2xf32>
      %193 = tpu.concatenate %171, %178, %185, %192 in 1 : vector<32x2xf32>, vector<32x2xf32>, vector<32x2xf32>, vector<32x2xf32> -> vector<32x8xf32>
      %194 = vector.extract_strided_slice %1 {offsets = [2, 0], sizes = [1, 8], strides = [1, 1]} : vector<4x8xf32> to vector<1x8xf32>
      %195 = vector.broadcast %194 : vector<1x8xf32> to vector<32x8xf32>
      %196 = arith.mulf %193, %195 : vector<32x8xf32>
      %197 = vector.extract_strided_slice %1 {offsets = [3, 0], sizes = [1, 8], strides = [1, 1]} : vector<4x8xf32> to vector<1x8xf32>
      %198 = vector.broadcast %197 : vector<1x8xf32> to vector<32x8xf32>
      %199 = arith.addf %196, %198 : vector<32x8xf32>
      %c0_121 = arith.constant 0 : index
      %c0_122 = arith.constant 0 : index
      %c0_123 = arith.constant 0 : index
      %200 = vector.load %arg8[%c0_121, %c0_122, %c0_123] : memref<1x32x8xf32, #tpu.memory_space<vmem>>, vector<1x32x8xf32>
      %201 = vector.shape_cast %200 : vector<1x32x8xf32> to vector<32x8xf32>
      %202 = vector.shape_cast %199 : vector<32x8xf32> to vector<1x32x8xf32>
      tpu.vector_store %arg8[%c0_121, %c0_122, %c0_123], %202 {strides = array<i32>} : memref<1x32x8xf32, #tpu.memory_space<vmem>>, vector<1x32x8xf32>,
    } else {
    }
    return
  }
  func.func @transform_0(%arg0: i32, %arg1: i32, %arg2: i32) -> (i32, i32, i32) {
    %c0_i32 = arith.constant 0 : i32
    %c0_i32_0 = arith.constant 0 : i32
    return %arg0, %arg1, %c0_i32 : i32, i32, i32
  }
  func.func @transform_1(%arg0: i32, %arg1: i32, %arg2: i32) -> (i32, i32, i32) {
    %c0_i32 = arith.constant 0 : i32
    %c0_i32_0 = arith.constant 0 : i32
    return %arg0, %arg2, %c0_i32 : i32, i32, i32
  }
  func.func @transform_2(%arg0: i32, %arg1: i32, %arg2: i32) -> (i32, i32, i32) {
    %c0_i32 = arith.constant 0 : i32
    %c0_i32_0 = arith.constant 0 : i32
    return %arg0, %arg2, %c0_i32 : i32, i32, i32
  }
  func.func @transform_3(%arg0: i32, %arg1: i32, %arg2: i32) -> (i32, i32) {
    %c0_i32 = arith.constant 0 : i32
    %c0_i32_0 = arith.constant 0 : i32
    %c0_i32_1 = arith.constant 0 : i32
    return %c0_i32, %c0_i32_0 : i32, i32
  }
  func.func @transform_4(%arg0: i32, %arg1: i32, %arg2: i32) -> (i32, i32) {
    %c0_i32 = arith.constant 0 : i32
    %c0_i32_0 = arith.constant 0 : i32
    %c0_i32_1 = arith.constant 0 : i32
    return %c0_i32, %c0_i32_0 : i32, i32
  }
  func.func @transform_5(%arg0: i32, %arg1: i32, %arg2: i32) -> (i32, i32, i32) {
    %c0_i32 = arith.constant 0 : i32
    %c0_i32_0 = arith.constant 0 : i32
    return %arg0, %arg1, %c0_i32 : i32, i32, i32
  }
}

</mosaic_0001>

<bundles_post_ra>
// kernel: tpu_custom_call.1
= control target key start
LH: loop header
LB: loop body
LE: loop exit
PB: predicated region body
PF: predicated region fallthrough
CT: control target
= control target key end

     0   :  { %s2910_s18 = smov 0   ;;  %s2912_s19 = smov 0   ;;  %s3724_s0 = inlined_call_operand.vmem [shape: f32[2,64,16], index: 0, kind: input, shape index: {}]   ;;  %s3725_s1 = inlined_call_operand.vmem [shape: f32[2,64,16], index: 1, kind: input, shape index: {}]   ;;  %s3726_s2 = inlined_call_operand.vmem [shape: f32[2,64,8], index: 2, kind: input, shape index: {}]   ;;  %s3727_s3 = inlined_call_operand.vmem [shape: f32[4,16], index: 3, kind: input, shape index: {}]   ;;  %s3728_s4 = inlined_call_operand.vmem [shape: f32[4,8], index: 4, kind: input, shape index: {}]   ;;  %s3729_s5 = inlined_call_operand.vmem [shape: f32[2,64,8], index: 5, kind: output, shape index: {}]  }
   0x1   :  { %s2914_s20 = smov 0   ;;  %s2916_s21 = smov 0  }
   0x2   :  { %s2918_s22 = smov 0   ;;  %s2920_s23 = smov 0  }
   0x3   :  { %s2922_s24 = smov 0  }
   0x4 LB: > { %s27_s25 = sadd.s32 1, %s2854_s21  ;;  %s30_s26 = sadd.s32 1, %s2858_s22  ;;  %s2866_s24 = sphi %s2922_s24, %s15_s24   ;;  %s2862_s23 = sphi %s2920_s23, %s3769_s23   ;;  %s2858_s22 = sphi %s2918_s22, %s3768_s22   ;;  %s2854_s21 = sphi %s2916_s21, %s3767_s21   ;;  %s2850_s20 = sphi %s2914_s20, %s3766_s20   ;;  %s2846_s19 = sphi %s2912_s19, %s3765_s19   ;;  %s2842_s18 = sphi %s2910_s18, %s3764_s18  }
   0x5   : > { %p28_p0 = scmp.ge.s32.totalorder %s27_s25, 2  ;;  %p2263_p1 = scmp.ge.s32.totalorder %s2866_s24, 1 }
   0x6   : > { %p249_p2 = scmp.lt.s32.totalorder %s2866_s24, 9  ;;  %s34_s27 = sadd.s32 1, %s2862_s23 }
   0x7   : > { %s3771_s25 = smov (%p28_p0, %s27_s25), 0  ;;  %s3773_s26 = smov (!%p28_p0, %s30_s26), %s2858_s22 }
   0x8   : > { %p250_p3 = pnand %p2263_p1, %p249_p2  ;;  %p32_p4 = scmp.ge.s32.totalorder %s3773_s26, 2 }
   0xa   : > { %s3775_s26 = smov (%p32_p4, %s3773_s26), 0  ;;  %s3777_s27 = smov (!%p32_p4, %s34_s27), %s2862_s23 }
   0xb   : > { %p36_p5 = scmp.ge.s32.totalorder %s3777_s27, 2  ;;  %253 = sbr.rel (%p250_p3) target bundleno = 2576 (0xa10), region = 40 }
   0xd   : > { %s3779_s27 = smov (%p36_p5, %s3777_s27), 0 }
  0x12   : > { %s2264_s28 = sshll.u32 %s2846_s19, 2  ;;  %p304_p6 = scmp.lt.s32.totalorder %s2850_s20, 1  ;;  %v2957_v0 = vld [vmem:[%s3727_s3] sm:$0xf] }
  0x13   : > { %v2962_v1 = vld [vmem:[%s3728_s4] sm:$0xf]  ;;  %p306_p7 = scmp.lt.s32.totalorder %s2264_s28, 7  ;;  %s2267_s8 = sshll.u32 %s2842_s18, 2 }
  0x14   : > { %3736 = vst [vmem:[#allocation6_spill] sm:$0xff] %v2962_v1  ;;  %s3781_s20 = smov (!%p304_p6, %s2850_s20), 1  ;;  %p316_p8 = scmp.lt.s32.totalorder %s2267_s8, 7 }
  0x15   : > { %s3783_s28 = smov (!%p306_p7, %s2264_s28), 7  ;;  %s2265_s9 = sshll.u32 %s3781_s20, 3 }
  0x16   : > { %s309_s10 = sadd.s32 %s2265_s9, %s3783_s28  ;;  %s3785_s8 = smov (!%p316_p8, %s2267_s8), 7 }
  0x17   : > { %s2266_s11 = sshll.u32 %s309_s10, 3  ;;  %s319_s19 = sadd.s32 %s2265_s9, %s3785_s8 }
  0x18   : > { %s2968_s14 = scalar_lea.vmem %s3724_s0, %s2266_s11  ;;  %s2973_s17 = scalar_lea.vmem %s3729_s5, %s2266_s11 }
  0x19   : > { %s2269_s29 = sshll.u32 %s319_s19, 3  ;;  %p2276_p9 = scmp.ne.s32.totalorder %s2842_s18, 0 }
  0x1a   : > { %s2978_s20 = scalar_lea.vmem %s3725_s1, %s2269_s29  ;;  %s2983_s10 = scalar_lea.vmem %s3726_s2, %s2269_s29  ;;  %v353_v2 = vlaneseq (!%p2276_p9)  ;;  %vm374_vm0 = vcmask (!%p2276_p9), 7168   ;;  %v2868_v3 = vmov (!%p2276_p9), -inf   ;;  %vm407_vm1 = vcmask (!%p2276_p9), 15360   ;;  %v349_v6 = vld [vmem:[%s2968_s14] sm:$0xff] (!%p2276_p9)  ;;  %v350_v9 = vld [vmem:[%s2968_s14 + $0x8] sm:$0xff] (!%p2276_p9)  ;;  %v351_v10 = vld [vmem:[%s2968_s14 + $0x10] sm:$0xff] (!%p2276_p9) }
  0x1b   : > { %348 = sbr.rel (%p2276_p9) target bundleno = 53 (0x35), region = 44  ;;  %375 = vst.msk [vmem:[#allocation3] sm:$0xff] (!%p2276_p9), %vm374_vm0, %v2868_v3  ;;  %376 = vst.msk [vmem:[#allocation3 + $0x8] sm:$0xff] (!%p2276_p9), %vm374_vm0, %v2868_v3  ;;  %v2869_v5 = vmov (!%p2276_p9), 0.0   ;;  %v352_v11 = vld [vmem:[%s2968_s14 + $0x18] sm:$0xff] (!%p2276_p9)  ;;  %vm369_vm2 = vcmask (!%p2276_p9), 130048  }
  0x1c   : > { %377 = vst.msk [vmem:[#allocation3 + $0x10] sm:$0xff] (!%p2276_p9), %vm374_vm0, %v2868_v3  ;;  %378 = vst.msk [vmem:[#allocation3 + $0x18] sm:$0xff] (!%p2276_p9), %vm374_vm0, %v2868_v3  ;;  %v354_v4 = vshrl.u32 (!%p2276_p9), %v353_v2, 7 }
  0x1d   : > { %379 = vst.msk [vmem:[#allocation3 + $0x20] sm:$0xff] (!%p2276_p9), %vm374_vm0, %v2868_v3  ;;  %380 = vst.msk [vmem:[#allocation3 + $0x28] sm:$0xff] (!%p2276_p9), %vm374_vm0, %v2868_v3 }
  0x1e   : > { %381 = vst.msk [vmem:[#allocation3 + $0x30] sm:$0xff] (!%p2276_p9), %vm374_vm0, %v2868_v3  ;;  %382 = vst.msk [vmem:[#allocation3 + $0x38] sm:$0xff] (!%p2276_p9), %vm374_vm0, %v2868_v3  ;;  %v355_v7 = vsub.s32 (!%p2276_p9), 0, %v354_v4  ;;  %v363_v8 = vsub.s32 (!%p2276_p9), 1, %v354_v4 }
  0x1f   : > { %383 = vst.msk [vmem:[#allocation3 + $0x40] sm:$0xff] (!%p2276_p9), %vm374_vm0, %v2868_v3  ;;  %384 = vst.msk [vmem:[#allocation3 + $0x48] sm:$0xff] (!%p2276_p9), %vm374_vm0, %v2868_v3 }
  0x20   : > { %385 = vst.msk [vmem:[#allocation3 + $0x50] sm:$0xff] (!%p2276_p9), %vm374_vm0, %v2868_v3  ;;  %386 = vst.msk [vmem:[#allocation3 + $0x58] sm:$0xff] (!%p2276_p9), %vm374_vm0, %v2868_v3  ;;  %v356_v12 = vrot.slane (!%p2276_p9), %v2957_v0, %v355_v7  ;;  %v364_v13 = vrot.slane (!%p2276_p9), %v2957_v0, %v363_v8 }
  0x21   : > { %387 = vst.msk [vmem:[#allocation3 + $0x60] sm:$0xff] (!%p2276_p9), %vm374_vm0, %v2868_v3  ;;  %388 = vst.msk [vmem:[#allocation3 + $0x68] sm:$0xff] (!%p2276_p9), %vm374_vm0, %v2868_v3 }
  0x22   : > { %389 = vst.msk [vmem:[#allocation3 + $0x70] sm:$0xff] %vm374_vm0, %v2868_v3  ;;  %390 = vst.msk [vmem:[#allocation3 + $0x78] sm:$0xff] %vm374_vm0, %v2868_v3  ;;  %v357_v14 = vmul.f32 %v356_v12, %v349_v6  ;;  %v358_v15 = vmul.f32 %v356_v12, %v350_v9  ;;  %v359_v16 = vmul.f32 %v356_v12, %v351_v10 }
  0x23   : > { %391 = vst.msk [vmem:[#allocation4] sm:$0xff] %vm374_vm0, %v2869_v5  ;;  %392 = vst.msk [vmem:[#allocation4 + $0x8] sm:$0xff] %vm374_vm0, %v2869_v5  ;;  %v360_v17 = vmul.f32 %v356_v12, %v352_v11 }
  0x24   : > { %393 = vst.msk [vmem:[#allocation4 + $0x10] sm:$0xff] %vm374_vm0, %v2869_v5  ;;  %394 = vst.msk [vmem:[#allocation4 + $0x18] sm:$0xff] %vm374_vm0, %v2869_v5  ;;  %v365_v18 = vadd.f32 %v364_v13, %v357_v14  ;;  %v366_v19 = vadd.f32 %v364_v13, %v358_v15  ;;  %v367_v20 = vadd.f32 %v364_v13, %v359_v16 }
  0x25   : > { %395 = vst.msk [vmem:[#allocation4 + $0x20] sm:$0xff] %vm374_vm0, %v2869_v5  ;;  %396 = vst.msk [vmem:[#allocation4 + $0x28] sm:$0xff] %vm374_vm0, %v2869_v5  ;;  %v368_v21 = vadd.f32 %v364_v13, %v360_v17 }
  0x26   : > { %397 = vst.msk [vmem:[#allocation4 + $0x30] sm:$0xff] %vm374_vm0, %v2869_v5  ;;  %398 = vst.msk [vmem:[#allocation4 + $0x38] sm:$0xff] %vm374_vm0, %v2869_v5 }
  0x27   : > { %399 = vst.msk [vmem:[#allocation4 + $0x40] sm:$0xff] %vm374_vm0, %v2869_v5  ;;  %400 = vst.msk [vmem:[#allocation4 + $0x48] sm:$0xff] %vm374_vm0, %v2869_v5 }
  0x28   : > { %401 = vst.msk [vmem:[#allocation4 + $0x50] sm:$0xff] %vm374_vm0, %v2869_v5  ;;  %402 = vst.msk [vmem:[#allocation4 + $0x58] sm:$0xff] %vm374_vm0, %v2869_v5 }
  0x29   : > { %403 = vst.msk [vmem:[#allocation4 + $0x60] sm:$0xff] %vm374_vm0, %v2869_v5  ;;  %404 = vst.msk [vmem:[#allocation4 + $0x68] sm:$0xff] %vm374_vm0, %v2869_v5 }
  0x2a   : > { %405 = vst.msk [vmem:[#allocation4 + $0x70] sm:$0xff] %vm374_vm0, %v2869_v5  ;;  %406 = vst.msk [vmem:[#allocation4 + $0x78] sm:$0xff] %vm374_vm0, %v2869_v5 }
  0x2b   : > { %408 = vst.msk [vmem:[#allocation5] sm:$0xff] %vm407_vm1, %v2869_v5  ;;  %409 = vst.msk [vmem:[#allocation5 + $0x8] sm:$0xff] %vm407_vm1, %v2869_v5 }
  0x2c   : > { %410 = vst.msk [vmem:[#allocation5 + $0x10] sm:$0xff] %vm407_vm1, %v2869_v5  ;;  %411 = vst.msk [vmem:[#allocation5 + $0x18] sm:$0xff] %vm407_vm1, %v2869_v5 }
  0x2d   : > { %412 = vst.msk [vmem:[#allocation5 + $0x20] sm:$0xff] %vm407_vm1, %v2869_v5  ;;  %413 = vst.msk [vmem:[#allocation5 + $0x28] sm:$0xff] %vm407_vm1, %v2869_v5 }
  0x2e   : > { %414 = vst.msk [vmem:[#allocation5 + $0x30] sm:$0xff] %vm407_vm1, %v2869_v5  ;;  %415 = vst.msk [vmem:[#allocation5 + $0x38] sm:$0xff] %vm407_vm1, %v2869_v5 }
  0x2f   : > { %416 = vst.msk [vmem:[#allocation5 + $0x40] sm:$0xff] %vm407_vm1, %v2869_v5  ;;  %417 = vst.msk [vmem:[#allocation5 + $0x48] sm:$0xff] %vm407_vm1, %v2869_v5 }
  0x30   : > { %418 = vst.msk [vmem:[#allocation5 + $0x50] sm:$0xff] %vm407_vm1, %v2869_v5  ;;  %419 = vst.msk [vmem:[#allocation5 + $0x58] sm:$0xff] %vm407_vm1, %v2869_v5 }
  0x31   : > { %420 = vst.msk [vmem:[#allocation5 + $0x60] sm:$0xff] %vm407_vm1, %v2869_v5  ;;  %421 = vst.msk [vmem:[#allocation5 + $0x68] sm:$0xff] %vm407_vm1, %v2869_v5 }
  0x32   : > { %422 = vst.msk [vmem:[#allocation5 + $0x70] sm:$0xff] %vm407_vm1, %v2869_v5  ;;  %423 = vst.msk [vmem:[#allocation5 + $0x78] sm:$0xff] %vm407_vm1, %v2869_v5 }
  0x33   : > { %370 = vst.msk [vmem:[#allocation2] sm:$0xff] %vm369_vm2, %v365_v18  ;;  %371 = vst.msk [vmem:[#allocation2 + $0x8] sm:$0xff] %vm369_vm2, %v366_v19 }
  0x34   : > { %372 = vst.msk [vmem:[#allocation2 + $0x10] sm:$0xff] %vm369_vm2, %v367_v20  ;;  %373 = vst.msk [vmem:[#allocation2 + $0x18] sm:$0xff] %vm369_vm2, %v368_v21 }
  0x35 PF: > { %v432_v22 = vlaneseq  ;;  %vm468_vm3 = vcmask 31744   ;;  %v428_v25 = vld [vmem:[%s2978_s20] sm:$0xff]  ;;  %v429_v28 = vld [vmem:[%s2978_s20 + $0x8] sm:$0xff]  ;;  %v430_v29 = vld [vmem:[%s2978_s20 + $0x10] sm:$0xff]  ;;  %vm582_vm5 = vcmask 261120   ;;  %v2870_v55 = vmov 0  }
  0x36   : > { %v431_v30 = vld [vmem:[%s2978_s20 + $0x18] sm:$0xff]  ;;  %vm3068_vm4 = vmpackc.low %vm468_vm3, %vm468_vm3  ;;  %2652 = vset.pattern.permute.xlu0 %v2870_v55  ;;  %2653 = vset.pattern.permute.xlu1 %v2870_v55  ;;  %v3112_v56 = vld [vmem:[#allocation3] sm:$0xff]  ;;  %vm667_vm6 = vcmask 7168   ;;  %s2871_s8 = smov 124   ;;  %s2872_s9 = smov 126   ;;  %vm801_vm7 = vcmask 15360  }
  0x37   : > { %v3042_v24 = vshrl.u32 %v432_v22, 7  ;;  %v3118_v60 = vld [vmem:[#allocation3 + $0x8] sm:$0xff]  ;;  %v3120_v61 = vld [vmem:[#allocation3 + $0x10] sm:$0xff]  ;;  %v448_v2 = vld [vmem:[%s2983_s10] sm:$0xff]  ;;  %s2873_s11 = smov 120   ;;  %s2874_s12 = smov 116  }
  0x38   : > { %v449_v3 = vld [vmem:[%s2983_s10 + $0x8] sm:$0xff]  ;;  %v3138_v11 = vld [vmem:[#allocation3 + $0x18] sm:$0xff]  ;;  %v450_v16 = vld [vmem:[%s2983_s10 + $0x10] sm:$0xff]  ;;  %s2875_s13 = smov 122   ;;  %p2325_p10 = scmp.ne.s32.totalorder %s2842_s18, 1 }
  0x39   : > { %3737 = vst [vmem:[#allocation7_spill] sm:$0xff] %v3042_v24  ;;  %v3731_v26 = vsub.s32 2, %v3042_v24  ;;  %v3730_v27 = vsub.s32 3, %v3042_v24  ;;  %v454_v58 = vsub.s32 0, %v3042_v24  ;;  %v462_v63 = vsub.s32 1, %v3042_v24  ;;  %v451_v17 = vld [vmem:[%s2983_s10 + $0x18] sm:$0xff] }
  0x3a   : > { %v3040_v23 = vld [vmem:[#allocation2] sm:$0xff]  ;;  %v3084_v44 = vld [vmem:[#allocation2 + $0x8] sm:$0xff]  ;;  %s2877_s18 = smov (!%p2325_p10), 2   ;;  %s2878_s14 = smov (!%p2325_p10), 4   ;;  %vm2101_vm8 = vcmask (!%p2325_p10), 48128   ;;  %vm2122_vm9 = vcmask (!%p2325_p10), 64512  }
  0x3b   : > { %2400 = vmatprep.mubr.msk.f32.mxu0 %vm468_vm3, %v3040_v23  ;;  %v435_v31 = vrot.slane %v2957_v0, %v3731_v26  ;;  %v443_v32 = vrot.slane %v2957_v0, %v3730_v27  ;;  %v3086_v45 = vld [vmem:[#allocation2 + $0x10] sm:$0xff]  ;;  %v3092_v46 = vld [vmem:[#allocation2 + $0x18] sm:$0xff]  ;;  %v455_v62 = vrot.slane %v2962_v1, %v454_v58  ;;  %v463_v8 = vrot.slane %v2962_v1, %v462_v63  ;;  %s2879_s15 = smov (!%p2325_p10), 6  }
  0x3d   : > { %v436_v33 = vmul.f32 %v435_v31, %v428_v25  ;;  %v437_v34 = vmul.f32 %v435_v31, %v429_v28  ;;  %v438_v35 = vmul.f32 %v435_v31, %v430_v29  ;;  %v439_v36 = vmul.f32 %v435_v31, %v431_v30 }
  0x3e   : > { %v456_v6 = vmul.f32 %v455_v62, %v448_v2  ;;  %v457_v7 = vmul.f32 %v455_v62, %v449_v3  ;;  %v458_v20 = vmul.f32 %v455_v62, %v450_v16  ;;  %v459_v21 = vmul.f32 %v455_v62, %v451_v17 }
  0x3f   : > { %v3058_v37 = vadd.f32 %v443_v32, %v436_v33  ;;  %v3060_v38 = vadd.f32 %v443_v32, %v437_v34  ;;  %v3062_v39 = vadd.f32 %v443_v32, %v438_v35  ;;  %v3064_v40 = vadd.f32 %v443_v32, %v439_v36 }
  0x40   : > { %v3140_v12 = vadd.f32 %v463_v8, %v456_v6  ;;  %v3142_v13 = vadd.f32 %v463_v8, %v457_v7  ;;  %v3162_v25 = vadd.f32 %v463_v8, %v458_v20  ;;  %v3164_v28 = vadd.f32 %v463_v8, %v459_v21 }
  0x41   : > { %v2504_v42 = vpack.c.bf16 %v3060_v38, %v3058_v37  ;;  %v2510_v43 = vpack.c.bf16 %v3064_v40, %v3062_v39  ;;  %v3176_v31 = vpack.i.bf16 %v3060_v38, %v3058_v37  ;;  %v3182_v32 = vpack.i.bf16 %v3064_v40, %v3062_v39 }
  0x42   : > { %v2516_v19 = vpack.c.bf16 %v3142_v13, %v3140_v12  ;;  %v2520_v30 = vpack.c.bf16 %v3164_v28, %v3162_v25 }
  0x43   : > { %2506 = vmatprep.subr.msk.bf16.mxu0 %vm3068_vm4, %v2504_v42 }
  0x44   : > { %2509 = vmatpush3.bf16.xpose.msk.msra.mxu0 %vm3068_vm4, %v2504_v42  ;;  %2517 = vmatprep.subr.bf16.mxu1 %v2516_v19 }
  0x45   : > { %2512 = vmatprep.subr.msk.bf16.mxu0 %vm3068_vm4, %v2510_v43  ;;  %2519 = vmatpush3.bf16.msra.mxu1 %v2516_v19 }
  0x46   : > { %2521 = vmatprep.subr.bf16.mxu1 %v2520_v30 }
  0x49   : > { %2523 = vmatpush3.bf16.msra.mxu1 %v2520_v30 }
  0x4c   : > { %2515 = vmatpush3.bf16.xpose.msk.msra.mxu0 %vm3068_vm4, %v2510_v43 }
  0x53   : > { %2401 = vmatmul.mubr.msk.f32.vlgmr.msra.gmra.mrb[0].mxu0 %vm468_vm3, %v3084_v44 }
  0x54   : > { %2403 = vmatprep.mubr.msk.f32.mxu0 %vm468_vm3, %v3086_v45 }
  0x57   : > { %2404 = vmatmul.mubr.msk.f32.gmra.mrb[2].mxu0 %vm468_vm3, %v3092_v46 }
 0x126   : > { %v3096_v47 = vpop.f32.mrb[0].mxu0 }
 0x127   : > { %v3098_v48 = vpop.f32.mrb[1].mxu0  ;;  %v586_v52 = vsel %vm582_vm5, %v3096_v47, -inf }
 0x128   : > { %v583_v49 = vsel %vm582_vm5, %v3098_v48, -inf }
 0x129   : > { %584 = vmax.xlane.f32.xlu0 %v583_v49 }
 0x12a   : > { %v3102_v50 = vpop.f32.mrb[2].mxu0 }
 0x12b   : > { %v3104_v51 = vpop.f32.mrb[3].mxu0  ;;  %v592_v54 = vsel %vm582_vm5, %v3102_v50, -inf }
 0x12c   : > { %v589_v53 = vsel %vm582_vm5, %v3104_v51, -inf }
 0x12d   : > { %587 = vmax.xlane.f32.xlu0 %v586_v52  ;;  %590 = vmax.xlane.f32.xlu1 %v589_v53 }
 0x131   : > { %593 = vmax.xlane.f32.xlu1 %v592_v54 }
 0x1b6   : > { %v585_v57 = vpop.xlane.xlu0 %584 }
 0x1b7   : > { %v3116_v59 = vmax.f32 %v3112_v56, %v585_v57 }
 0x1b9   : > { %806 = vst.msk [vmem:[#allocation3] sm:$0xff] %vm667_vm6, %v3116_v59  ;;  %613 = vperm.xlu0 %2652, %v3116_v59  }
 0x1ba   : > { %v588_v4 = vpop.xlane.xlu0 %587  ;;  %v591_v5 = vpop.xlane.xlu1 %590 }
 0x1bb   : > { %v3133_v9 = vmax.f32 %v3118_v60, %v588_v4  ;;  %v3136_v10 = vmax.f32 %v3120_v61, %v591_v5 }
 0x1bd   : > { %807 = vst.msk [vmem:[#allocation3 + $0x8] sm:$0xff] %vm667_vm6, %v3133_v9  ;;  %808 = vst.msk [vmem:[#allocation3 + $0x10] sm:$0xff] %vm667_vm6, %v3136_v10  ;;  %618 = vperm.xlu1 %2653, %v3133_v9   ;;  %816 = vrot.lane.b32.xlu0 %v3092_v46, %s2871_s8 }
 0x1be   : > { %v594_v18 = vpop.xlane.xlu1 %593 }
 0x1bf   : > { %v3160_v22 = vmax.f32 %v3138_v11, %v594_v18 }
 0x1c1   : > { %809 = vst.msk [vmem:[#allocation3 + $0x18] sm:$0xff] %vm667_vm6, %v3160_v22  ;;  %623 = vperm.xlu1 %2653, %v3136_v10  }
 0x1c5   : > { %628 = vperm.xlu1 %2653, %v3160_v22  }
 0x1c9   : > { %2655 = vrot.lane.b32.xlu1 %v3176_v31, %s2871_s8 }
 0x1cd   : > { %2660 = vrot.lane.b32.xlu1 %v3182_v32, %s2871_s8 }
 0x1d1   : > { %810 = vrot.lane.b32.xlu1 %v3040_v23, %s2871_s8 }
 0x1d5   : > { %812 = vrot.lane.b32.xlu1 %v3084_v44, %s2871_s8 }
 0x1d9   : > { %814 = vrot.lane.b32.xlu1 %v3086_v45, %s2871_s8 }
 0x238   : > { %v614_v33 = vpop.permute.xlu0 %613 }
 0x239   : > { %v631_v34 = vsub.f32 %v3098_v48, %v614_v33 }
 0x23b   : > { %v635_v35 = vmul.f32 1.442695, %v631_v34 }
 0x23c   : > { %v619_v36 = vpop.permute.xlu1 %618  ;;  %v817_v6 = vpop.permute.xlu0 %816 }
 0x23d   : > { %2714 = vpow2.f32 %v635_v35  ;;  %v632_v37 = vsub.f32 %v3096_v47, %v619_v36  ;;  %v3239_v36 = vld [vmem:[#allocation3 + $0x28] sm:$0xff] }
 0x23f   : > { %v637_v38 = vmul.f32 1.442695, %v632_v37  ;;  %v3241_v37 = vld [vmem:[#allocation3 + $0x20] sm:$0xff] }
 0x240   : > { %v624_v39 = vpop.permute.xlu1 %623 }
 0x241   : > { %2716 = vpow2.f32 %v637_v38  ;;  %v633_v40 = vsub.f32 %v3104_v51, %v624_v39 }
 0x243   : > { %v639_v42 = vmul.f32 1.442695, %v633_v40 }
 0x244   : > { %v629_v43 = vpop.permute.xlu1 %628 }
 0x245   : > { %2718 = vpow2.f32 %v639_v42  ;;  %v634_v49 = vsub.f32 %v3102_v50, %v629_v43 }
 0x247   : > { %v3196_v52 = vpop.eup %2714  ;;  %v641_v53 = vmul.f32 1.442695, %v634_v49  ;;  %v3254_v49 = vld [vmem:[#allocation3 + $0x30] sm:$0xff] }
 0x248   : > { %2414 = vmatprep.mubr.msk.f32.mxu1 %vm582_vm5, %v3196_v52  ;;  %v2656_v48 = vpop.permute.xlu1 %2655 }
 0x249   : > { %2720 = vpow2.f32 %v641_v53  ;;  %v2658_v54 = vunpack.i.h.bf16 %v2656_v48  ;;  %v2657_v47 = vunpack.i.l.bf16 %v2656_v48  ;;  %v3256_v53 = vld [vmem:[#allocation3 + $0x38] sm:$0xff]  ;;  %v3260_v48 = vpack.i.bf16 %v3142_v13, %v3140_v12 }
 0x24a   : > { %v3276_v12 = vpack.i.bf16 %v3164_v28, %v3162_v25 }
 0x24b   : > { %v3200_v55 = vpop.eup %2716  ;;  %v2524_v57 = vpack.c.bf16 %v2658_v54, %v2657_v47 }
 0x24c   : > { %2415 = vmatmul.mubr.msk.f32.vlgmr.msra.gmra.mrb[0].mxu1 %vm582_vm5, %v3200_v55  ;;  %v2661_v51 = vpop.permute.xlu1 %2660 }
 0x24d   : > { %2526 = vmatprep.subr.msk.bf16.mxu1 %vm3068_vm4, %v2524_v57  ;;  %v2663_v50 = vunpack.i.h.bf16 %v2661_v51  ;;  %v2662_v58 = vunpack.i.l.bf16 %v2661_v51 }
 0x24e   : > { %2529 = vmatpush3.bf16.xpose.msk.msra.mxu1 %vm3068_vm4, %v2524_v57 }
 0x24f   : > { %v3208_v62 = vpop.eup %2718  ;;  %v2530_v63 = vpack.c.bf16 %v2663_v50, %v2662_v58 }
 0x250   : > { %2417 = vmatprep.mubr.msk.f32.mxu1 %vm582_vm5, %v3208_v62  ;;  %v811_v2 = vpop.permute.xlu1 %810 }
 0x251   : > { %2532 = vmatprep.subr.msk.bf16.mxu1 %vm3068_vm4, %v2530_v63 }
 0x253   : > { %v3214_v3 = vpop.eup %2720 }
 0x254   : > { %2418 = vmatmul.mubr.msk.f32.gmra.mrb[2].mxu1 %vm582_vm5, %v3214_v3  ;;  %v813_v4 = vpop.permute.xlu1 %812 }
 0x255   : > { %2428 = vmatprep.mubr.msk.f32.mxu1 %vm468_vm3, %v811_v2 }
 0x256   : > { %2535 = vmatpush3.bf16.xpose.msk.msra.mxu1 %vm3068_vm4, %v2530_v63 }
 0x258   : > { %v815_v5 = vpop.permute.xlu1 %814 }
 0x25d   : > { %2429 = vmatmul.mubr.msk.f32.vlgmr.msra.gmra.mrb[4].mxu1 %vm468_vm3, %v813_v4 }
 0x25e   : > { %2431 = vmatprep.mubr.msk.f32.mxu1 %vm468_vm3, %v815_v5 }
 0x261   : > { %2432 = vmatmul.mubr.msk.f32.gmra.mrb[6].mxu1 %vm468_vm3, %v817_v6 }
 0x31f   : > { %v3224_v7 = vpop.f32.mrb[0].mxu1 }
 0x320   : > { %v3226_v8 = vpop.f32.mrb[1].mxu1 }
 0x327   : > { %v3228_v16 = vpop.f32.mrb[2].mxu1 }
 0x328   : > { %v3230_v17 = vpop.f32.mrb[3].mxu1 }
 0x330   : > { %v2430_v18 = vpop.f32.mrb[4].mxu1 }
 0x331   : > { %v908_v19 = vpop.f32.mrb[5].mxu1  ;;  %v935_v20 = vsel %vm582_vm5, %v2430_v18, -inf }
 0x332   : > { %936 = vmax.xlane.f32.xlu0 %v935_v20  ;;  %v932_v21 = vsel %vm582_vm5, %v908_v19, -inf }
 0x333   : > { %933 = vmax.xlane.f32.xlu1 %v932_v21 }
 0x334   : > { %v3234_v30 = vpop.f32.mrb[6].mxu1 }
 0x335   : > { %v918_v33 = vpop.f32.mrb[7].mxu1  ;;  %v941_v34 = vsel %vm582_vm5, %v3234_v30, -inf }
 0x336   : > { %v938_v35 = vsel %vm582_vm5, %v918_v33, -inf }
 0x337   : > { %939 = vmax.xlane.f32.xlu0 %v938_v35  ;;  %942 = vmax.xlane.f32.xlu1 %v941_v34 }
 0x3bf   : > { %v937_v38 = vpop.xlane.xlu0 %936 }
 0x3c0   : > { %v3244_v39 = vmax.f32 %v3239_v36, %v937_v38  ;;  %v934_v40 = vpop.xlane.xlu1 %933 }
 0x3c1   : > { %v3247_v42 = vmax.f32 %v3241_v37, %v934_v40 }
 0x3c2   : > { %1172 = vst.msk [vmem:[#allocation3 + $0x28] sm:$0xff] %vm667_vm6, %v3244_v39  ;;  %967 = vperm.xlu1 %2653, %v3244_v39  }
 0x3c3   : > { %1171 = vst.msk [vmem:[#allocation3 + $0x20] sm:$0xff] %vm667_vm6, %v3247_v42  ;;  %962 = vperm.xlu0 %2652, %v3247_v42  }
 0x3c4   : > { %v940_v47 = vpop.xlane.xlu0 %939  ;;  %v943_v57 = vpop.xlane.xlu1 %942 }
 0x3c5   : > { %v3268_v51 = vmax.f32 %v3254_v49, %v940_v47  ;;  %v3271_v50 = vmax.f32 %v3256_v53, %v943_v57 }
 0x3c6   : > { %2665 = vrot.lane.b32.xlu1 %v3260_v48, %s2872_s9 }
 0x3c7   : > { %1173 = vst.msk [vmem:[#allocation3 + $0x30] sm:$0xff] %vm667_vm6, %v3268_v51  ;;  %972 = vperm.xlu0 %2652, %v3268_v51   ;;  %1174 = vst.msk [vmem:[#allocation3 + $0x38] sm:$0xff] %vm667_vm6, %v3271_v50 }
 0x3ca   : > { %2670 = vrot.lane.b32.xlu1 %v3276_v12, %s2872_s9 }
 0x3cb   : > { %977 = vperm.xlu0 %2652, %v3271_v50  }
 0x3ce   : > { %2675 = vrot.lane.b32.xlu1 %v3176_v31, %s2873_s11 }
 0x3cf   : > { %2680 = vrot.lane.b32.xlu0 %v3182_v32, %s2873_s11 }
 0x3d2   : > { %1175 = vrot.lane.b32.xlu1 %v3040_v23, %s2873_s11 }
 0x3d3   : > { %1177 = vrot.lane.b32.xlu0 %v3084_v44, %s2873_s11 }
 0x3d6   : > { %1179 = vrot.lane.b32.xlu1 %v3086_v45, %s2873_s11 }
 0x3d7   : > { %1181 = vrot.lane.b32.xlu0 %v3092_v46, %s2873_s11 }
 0x441   : > { %v968_v25 = vpop.permute.xlu1 %967 }
 0x442   : > { %v981_v28 = vsub.f32 %v2430_v18, %v968_v25  ;;  %v963_v63 = vpop.permute.xlu0 %962 }
 0x443   : > { %v980_v2 = vsub.f32 %v908_v19, %v963_v63 }
 0x444   : > { %v986_v4 = vmul.f32 1.442695, %v981_v28 }
 0x445   : > { %v984_v5 = vmul.f32 1.442695, %v980_v2  ;;  %v2666_v6 = vpop.permute.xlu1 %2665 }
 0x446   : > { %v2668_v20 = vunpack.i.h.bf16 %v2666_v6  ;;  %v2667_v21 = vunpack.i.l.bf16 %v2666_v6  ;;  %v973_v34 = vpop.permute.xlu0 %972 }
 0x447   : > { %2722 = vpow2.f32 %v984_v5  ;;  %v982_v35 = vsub.f32 %v918_v33, %v973_v34 }
 0x448   : > { %2724 = vpow2.f32 %v986_v4  ;;  %v2536_v38 = vpack.c.bf16 %v2668_v20, %v2667_v21 }
 0x449   : > { %v988_v40 = vmul.f32 1.442695, %v982_v35  ;;  %v2671_v47 = vpop.permute.xlu1 %2670 }
 0x44a   : > { %v2673_v57 = vunpack.i.h.bf16 %v2671_v47  ;;  %v2672_v27 = vunpack.i.l.bf16 %v2671_v47  ;;  %2537 = vmatprep.subr.bf16.mxu0 %v2536_v38  ;;  %v978_v26 = vpop.permute.xlu0 %977 }
 0x44b   : > { %2726 = vpow2.f32 %v988_v40  ;;  %v983_v18 = vsub.f32 %v3234_v30, %v978_v26  ;;  %2539 = vmatpush3.bf16.msra.mxu0 %v2536_v38 }
 0x44c   : > { %v2540_v19 = vpack.c.bf16 %v2673_v57, %v2672_v27 }
 0x44d   : > { %v990_v25 = vmul.f32 1.442695, %v983_v18  ;;  %v2676_v28 = vpop.permute.xlu1 %2675 }
 0x44e   : > { %2541 = vmatprep.subr.bf16.mxu0 %v2540_v19  ;;  %v2678_v63 = vunpack.i.h.bf16 %v2676_v28  ;;  %v2677_v2 = vunpack.i.l.bf16 %v2676_v28  ;;  %v2681_v5 = vpop.permute.xlu0 %2680 }
 0x44f   : > { %2728 = vpow2.f32 %v990_v25  ;;  %2543 = vmatpush3.bf16.msra.mxu0 %v2540_v19  ;;  %v2683_v6 = vunpack.i.h.bf16 %v2681_v5  ;;  %v2682_v20 = vunpack.i.l.bf16 %v2681_v5 }
 0x450   : > { %v2544_v33 = vpack.c.bf16 %v2678_v63, %v2677_v2 }
 0x451   : > { %v3296_v4 = vpop.eup %2722  ;;  %v2550_v27 = vpack.c.bf16 %v2683_v6, %v2682_v20  ;;  %v1176_v30 = vpop.permute.xlu1 %1175 }
 0x452   : > { %v3298_v21 = vpop.eup %2724  ;;  %2442 = vmatprep.mubr.msk.f32.mxu0 %vm582_vm5, %v3296_v4  ;;  %2546 = vmatprep.subr.msk.bf16.mxu0 %vm3068_vm4, %v2544_v33  ;;  %v1178_v35 = vpop.permute.xlu0 %1177 }
 0x453   : > { %2443 = vmatmul.mubr.msk.f32.vlgmr.msra.gmra.mrb[4].mxu0 %vm582_vm5, %v3298_v21 }
 0x455   : > { %v3306_v26 = vpop.eup %2726  ;;  %v1180_v38 = vpop.permute.xlu1 %1179 }
 0x456   : > { %2445 = vmatprep.mubr.msk.f32.mxu0 %vm582_vm5, %v3306_v26  ;;  %v1182_v40 = vpop.permute.xlu0 %1181 }
 0x458   : > { %2549 = vmatpush3.bf16.xpose.msk.msra.mxu0 %vm3068_vm4, %v2544_v33 }
 0x459   : > { %v3312_v34 = vpop.eup %2728  ;;  %2552 = vmatprep.subr.msk.bf16.mxu0 %vm3068_vm4, %v2550_v27 }
 0x45a   : > { %2446 = vmatmul.mubr.msk.f32.gmra.mrb[6].mxu0 %vm582_vm5, %v3312_v34 }
 0x45b   : > { %2456 = vmatprep.mubr.msk.f32.mxu0 %vm468_vm3, %v1176_v30  ;;  %v3341_v30 = vld [vmem:[#allocation3 + $0x40] sm:$0xff] }
 0x460   : > { %2555 = vmatpush3.bf16.xpose.msk.msra.mxu0 %vm3068_vm4, %v2550_v27  ;;  %v3339_v27 = vld [vmem:[#allocation3 + $0x48] sm:$0xff] }
 0x467   : > { %2457 = vmatmul.mubr.msk.f32.vlgmr.msra.gmra.mrb[8].mxu0 %vm468_vm3, %v1178_v35 }
 0x468   : > { %2459 = vmatprep.mubr.msk.f32.mxu0 %vm468_vm3, %v1180_v38 }
 0x46b   : > { %2460 = vmatmul.mubr.msk.f32.gmra.mrb[10].mxu0 %vm468_vm3, %v1182_v40 }
 0x526   : > { %v3324_v47 = vpop.f32.mrb[4].mxu0 }
 0x527   : > { %v3326_v57 = vpop.f32.mrb[5].mxu0 }
 0x52d   : > { %v3328_v18 = vpop.f32.mrb[6].mxu0 }
 0x52e   : > { %v3330_v19 = vpop.f32.mrb[7].mxu0 }
 0x53a   : > { %v2458_v25 = vpop.f32.mrb[8].mxu0 }
 0x53b   : > { %v1273_v28 = vpop.f32.mrb[9].mxu0  ;;  %v1300_v63 = vsel %vm582_vm5, %v2458_v25, -inf }
 0x53c   : > { %1301 = vmax.xlane.f32.xlu0 %v1300_v63  ;;  %v1297_v2 = vsel %vm582_vm5, %v1273_v28, -inf }
 0x53d   : > { %1298 = vmax.xlane.f32.xlu1 %v1297_v2 }
 0x53e   : > { %v3334_v5 = vpop.f32.mrb[10].mxu0 }
 0x53f   : > { %v1283_v33 = vpop.f32.mrb[11].mxu0  ;;  %v1306_v6 = vsel %vm582_vm5, %v3334_v5, -inf }
 0x540   : > { %v1303_v20 = vsel %vm582_vm5, %v1283_v33, -inf }
 0x541   : > { %1304 = vmax.xlane.f32.xlu0 %v1303_v20  ;;  %1307 = vmax.xlane.f32.xlu1 %v1306_v6  ;;  %v3354_v6 = vld [vmem:[#allocation3 + $0x50] sm:$0xff]  ;;  %v3356_v20 = vld [vmem:[#allocation3 + $0x58] sm:$0xff] }
 0x5c9   : > { %v1302_v35 = vpop.xlane.xlu0 %1301 }
 0x5ca   : > { %v3344_v38 = vmax.f32 %v3339_v27, %v1302_v35  ;;  %v1299_v40 = vpop.xlane.xlu1 %1298 }
 0x5cb   : > { %v3347_v63 = vmax.f32 %v3341_v30, %v1299_v40 }
 0x5cc   : > { %1533 = vst.msk [vmem:[#allocation3 + $0x48] sm:$0xff] %vm667_vm6, %v3344_v38  ;;  %1332 = vperm.xlu1 %2653, %v3344_v38  }
 0x5cd   : > { %1532 = vst.msk [vmem:[#allocation3 + $0x40] sm:$0xff] %vm667_vm6, %v3347_v63  ;;  %1327 = vperm.xlu0 %2652, %v3347_v63  }
 0x5ce   : > { %v1305_v40 = vpop.xlane.xlu0 %1304  ;;  %v1308_v58 = vpop.xlane.xlu1 %1307 }
 0x5cf   : > { %v3364_v2 = vmax.f32 %v3354_v6, %v1305_v40  ;;  %v3367_v13 = vmax.f32 %v3356_v20, %v1308_v58 }
 0x5d0   : > { %2685 = vrot.lane.b32.xlu1 %v3260_v48, %s2871_s8 }
 0x5d1   : > { %1534 = vst.msk [vmem:[#allocation3 + $0x50] sm:$0xff] %vm667_vm6, %v3364_v2  ;;  %1337 = vperm.xlu0 %2652, %v3364_v2   ;;  %1535 = vst.msk [vmem:[#allocation3 + $0x58] sm:$0xff] %vm667_vm6, %v3367_v13 }
 0x5d4   : > { %2690 = vrot.lane.b32.xlu1 %v3276_v12, %s2871_s8 }
 0x5d5   : > { %1342 = vperm.xlu0 %2652, %v3367_v13  }
 0x5d8   : > { %2695 = vrot.lane.b32.xlu1 %v3176_v31, %s2874_s12 }
 0x5d9   : > { %2700 = vrot.lane.b32.xlu0 %v3182_v32, %s2874_s12 }
 0x5dc   : > { %1536 = vrot.lane.b32.xlu1 %v3040_v23, %s2874_s12 }
 0x5dd   : > { %1538 = vrot.lane.b32.xlu0 %v3084_v44, %s2874_s12 }
 0x5e0   : > { %1540 = vrot.lane.b32.xlu1 %v3086_v45, %s2874_s12 }
 0x5e1   : > { %1542 = vrot.lane.b32.xlu0 %v3092_v46, %s2874_s12 }
 0x64b   : > { %v1333_v58 = vpop.permute.xlu1 %1332 }
 0x64c   : > { %v1346_v40 = vsub.f32 %v2458_v25, %v1333_v58  ;;  %v1328_v35 = vpop.permute.xlu0 %1327 }
 0x64d   : > { %v1345_v54 = vsub.f32 %v1273_v28, %v1328_v35 }
 0x64e   : > { %v1351_v43 = vmul.f32 1.442695, %v1346_v40 }
 0x64f   : > { %v1349_v29 = vmul.f32 1.442695, %v1345_v54  ;;  %v2686_v15 = vpop.permute.xlu1 %2685 }
 0x650   : > { %v2688_v14 = vunpack.i.h.bf16 %v2686_v15  ;;  %v2687_v0 = vunpack.i.l.bf16 %v2686_v15  ;;  %v1338_v31 = vpop.permute.xlu0 %1337 }
 0x651   : > { %2730 = vpow2.f32 %v1349_v29  ;;  %v1347_v32 = vsub.f32 %v1283_v33, %v1338_v31 }
 0x652   : > { %2732 = vpow2.f32 %v1351_v43  ;;  %v2556_v23 = vpack.c.bf16 %v2688_v14, %v2687_v0 }
 0x653   : > { %v1353_v1 = vmul.f32 1.442695, %v1347_v32  ;;  %v2691_v44 = vpop.permute.xlu1 %2690 }
 0x654   : > { %v2693_v24 = vunpack.i.h.bf16 %v2691_v44  ;;  %v2692_v45 = vunpack.i.l.bf16 %v2691_v44  ;;  %2557 = vmatprep.subr.bf16.mxu1 %v2556_v23  ;;  %v1343_v46 = vpop.permute.xlu0 %1342 }
 0x655   : > { %2734 = vpow2.f32 %v1353_v1  ;;  %v1348_v25 = vsub.f32 %v3334_v5, %v1343_v46  ;;  %2559 = vmatpush3.bf16.msra.mxu1 %v2556_v23 }
 0x656   : > { %v2560_v28 = vpack.c.bf16 %v2693_v24, %v2692_v45 }
 0x657   : > { %v1355_v54 = vmul.f32 1.442695, %v1348_v25  ;;  %v2696_v35 = vpop.permute.xlu1 %2695 }
 0x658   : > { %2561 = vmatprep.subr.bf16.mxu1 %v2560_v28  ;;  %v2698_v15 = vunpack.i.h.bf16 %v2696_v35  ;;  %v2697_v58 = vunpack.i.l.bf16 %v2696_v35  ;;  %v2701_v29 = vpop.permute.xlu0 %2700 }
 0x659   : > { %2736 = vpow2.f32 %v1355_v54  ;;  %2563 = vmatpush3.bf16.msra.mxu1 %v2560_v28  ;;  %v2703_v43 = vunpack.i.h.bf16 %v2701_v29  ;;  %v2702_v33 = vunpack.i.l.bf16 %v2701_v29 }
 0x65a   : > { %v2564_v0 = vpack.c.bf16 %v2698_v15, %v2697_v58 }
 0x65b   : > { %v3390_v14 = vpop.eup %2730  ;;  %v2570_v24 = vpack.c.bf16 %v2703_v43, %v2702_v33  ;;  %v1537_v5 = vpop.permute.xlu1 %1536  ;;  %v3442_v33 = vld [vmem:[#allocation3 + $0x68] sm:$0xff] }
 0x65c   : > { %v3392_v40 = vpop.eup %2732  ;;  %2470 = vmatprep.mubr.msk.f32.mxu1 %vm582_vm5, %v3390_v14  ;;  %2566 = vmatprep.subr.msk.bf16.mxu1 %vm3068_vm4, %v2564_v0  ;;  %v1539_v32 = vpop.permute.xlu0 %1538 }
 0x65d   : > { %2471 = vmatmul.mubr.msk.f32.vlgmr.msra.gmra.mrb[8].mxu1 %vm582_vm5, %v3392_v40 }
 0x65f   : > { %v3400_v1 = vpop.eup %2734  ;;  %v1541_v23 = vpop.permute.xlu1 %1540 }
 0x660   : > { %2473 = vmatprep.mubr.msk.f32.mxu1 %vm582_vm5, %v3400_v1  ;;  %v1543_v44 = vpop.permute.xlu0 %1542 }
 0x662   : > { %2569 = vmatpush3.bf16.xpose.msk.msra.mxu1 %vm3068_vm4, %v2564_v0 }
 0x663   : > { %v3406_v31 = vpop.eup %2736  ;;  %2572 = vmatprep.subr.msk.bf16.mxu1 %vm3068_vm4, %v2570_v24 }
 0x664   : > { %2474 = vmatmul.mubr.msk.f32.gmra.mrb[10].mxu1 %vm582_vm5, %v3406_v31 }
 0x665   : > { %2484 = vmatprep.mubr.msk.f32.mxu1 %vm468_vm3, %v1537_v5 }
 0x66a   : > { %2575 = vmatpush3.bf16.xpose.msk.msra.mxu1 %vm3068_vm4, %v2570_v24  ;;  %v3444_v24 = vld [vmem:[#allocation3 + $0x60] sm:$0xff] }
 0x671   : > { %2485 = vmatmul.mubr.msk.f32.vlgmr.msra.gmra.mrb[12].mxu1 %vm468_vm3, %v1539_v32 }
 0x672   : > { %2487 = vmatprep.mubr.msk.f32.mxu1 %vm468_vm3, %v1541_v23 }
 0x675   : > { %2488 = vmatmul.mubr.msk.f32.gmra.mrb[14].mxu1 %vm468_vm3, %v1543_v44 }
 0x730   : > { %v3418_v45 = vpop.f32.mrb[8].mxu1 }
 0x731   : > { %v3420_v46 = vpop.f32.mrb[9].mxu1 }
 0x737   : > { %v3422_v25 = vpop.f32.mrb[10].mxu1 }
 0x738   : > { %3740 = vst [vmem:[#allocation8_spill] sm:$0xff] %v3422_v25  ;;  %v3424_v28 = vpop.f32.mrb[11].mxu1 }
 0x739   : > { %3741 = vst [vmem:[#allocation9_spill] sm:$0xff] %v3424_v28  ;;  %v1004_v28 = vsel %vm582_vm5, %v3298_v21, 0.0  ;;  %v1366_v21 = vsel %vm582_vm5, %v3390_v14, 0.0  ;;  %v3745_v14 = vsub.f32 %v3138_v11, %v3160_v22 }
 0x744   : > { %v3426_v54 = vpop.f32.mrb[12].mxu1 }
 0x745   : > { %v3428_v41 = vpop.f32.mrb[13].mxu1  ;;  %v1661_v35 = vsel %vm582_vm5, %v3426_v54, -inf }
 0x746   : > { %1662 = vmax.xlane.f32.xlu0 %v1661_v35  ;;  %v1658_v15 = vsel %vm582_vm5, %v3428_v41, -inf }
 0x747   : > { %1659 = vmax.xlane.f32.xlu1 %v1658_v15  ;;  %v3457_v15 = vld [vmem:[#allocation3 + $0x78] sm:$0xff] }
 0x748   : > { %v3434_v58 = vpop.f32.mrb[14].mxu1 }
 0x749   : > { %v3436_v29 = vpop.f32.mrb[15].mxu1  ;;  %v1667_v0 = vsel %vm582_vm5, %v3434_v58, -inf }
 0x74a   : > { %v1664_v43 = vsel %vm582_vm5, %v3436_v29, -inf }
 0x74b   : > { %1668 = vmax.xlane.f32.xlu1 %v1667_v0  ;;  %1665 = vmax.xlane.f32.xlu0 %v1664_v43  ;;  %v3459_v0 = vld [vmem:[#allocation3 + $0x70] sm:$0xff]  ;;  %v651_v43 = vsel %vm582_vm5, %v3196_v52, 0.0  ;;  %v1369_v52 = vsel %vm582_vm5, %v3392_v40, 0.0 }
 0x7d3   : > { %v1663_v5 = vpop.xlane.xlu0 %1662 }
 0x7d4   : > { %v3447_v32 = vmax.f32 %v3442_v33, %v1663_v5  ;;  %v1660_v23 = vpop.xlane.xlu1 %1659 }
 0x7d5   : > { %v3450_v44 = vmax.f32 %v3444_v24, %v1660_v23 }
 0x7d6   : > { %1894 = vst.msk [vmem:[#allocation3 + $0x68] sm:$0xff] %vm667_vm6, %v3447_v32  ;;  %1693 = vperm.xlu1 %2653, %v3447_v32  }
 0x7d7   : > { %1893 = vst.msk [vmem:[#allocation3 + $0x60] sm:$0xff] %vm667_vm6, %v3450_v44  ;;  %1688 = vperm.xlu0 %2652, %v3450_v44  }
 0x7d8   : > { %v1669_v5 = vpop.xlane.xlu1 %1668  ;;  %v1666_v23 = vpop.xlane.xlu0 %1665 }
 0x7d9   : > { %v3467_v35 = vmax.f32 %v3457_v15, %v1669_v5  ;;  %v3470_v25 = vmax.f32 %v3459_v0, %v1666_v23  ;;  %v654_v5 = vsel %vm582_vm5, %v3200_v55, 0.0  ;;  %v657_v23 = vsel %vm582_vm5, %v3208_v62, 0.0 }
 0x7da   : > { %v1007_v55 = vsel %vm582_vm5, %v3306_v26, 0.0  ;;  %v1001_v62 = vsel %vm582_vm5, %v3296_v4, 0.0  ;;  %v1375_v4 = vsel %vm582_vm5, %v3406_v31, 0.0  ;;  %v3742_v26 = vsub.f32 %v3112_v56, %v3116_v59 }
 0x7db   : > { %1896 = vst.msk [vmem:[#allocation3 + $0x78] sm:$0xff] %vm667_vm6, %v3467_v35  ;;  %1895 = vst.msk [vmem:[#allocation3 + $0x70] sm:$0xff] %vm667_vm6, %v3470_v25  ;;  %1703 = vperm.xlu0 %2652, %v3467_v35   ;;  %1698 = vperm.xlu1 %2653, %v3470_v25   ;;  %v3746_v31 = vsub.f32 %v3239_v36, %v3244_v39  ;;  %v3747_v59 = vsub.f32 %v3241_v37, %v3247_v42 }
 0x7dc   : > { %v603_v40 = vmul.f32 1.442695, %v3742_v26  ;;  %v3750_v36 = vsub.f32 %v3339_v27, %v3344_v38  ;;  %v3751_v39 = vsub.f32 %v3341_v30, %v3347_v63  ;;  %v3753_v30 = vsub.f32 %v3356_v20, %v3367_v13 }
 0x7dd   : > { %v954_v56 = vmul.f32 1.442695, %v3746_v31  ;;  %v3755_v13 = vsub.f32 %v3444_v24, %v3450_v44 }
 0x7de   : > { %2738 = vpow2.f32 %v603_v40  ;;  %v1319_v37 = vmul.f32 1.442695, %v3750_v36  ;;  %v1317_v42 = vmul.f32 1.442695, %v3751_v39  ;;  %v1323_v63 = vmul.f32 1.442695, %v3753_v30 }
 0x7df   : > { %2710 = vrot.lane.b32.xlu0 %v3276_v12, %s2875_s13  ;;  %2705 = vrot.lane.b32.xlu1 %v3260_v48, %s2875_s13  ;;  %v660_v12 = vsel %vm582_vm5, %v3214_v3, 0.0  ;;  %v1010_v48 = vsel %vm582_vm5, %v3312_v34, 0.0  ;;  %v1372_v3 = vsel %vm582_vm5, %v3400_v1, 0.0  ;;  %v3743_v34 = vsub.f32 %v3118_v60, %v3133_v9 }
 0x7e0   : > { %v3744_v1 = vsub.f32 %v3120_v61, %v3136_v10  ;;  %v952_v60 = vmul.f32 1.442695, %v3747_v59  ;;  %v3748_v61 = vsub.f32 %v3254_v49, %v3268_v51  ;;  %v3749_v10 = vsub.f32 %v3256_v53, %v3271_v50 }
 0x7e1   : > { %v3752_v51 = vsub.f32 %v3354_v6, %v3364_v2  ;;  %v3754_v2 = vsub.f32 %v3442_v33, %v3447_v32  ;;  %v1678_v20 = vmul.f32 1.442695, %v3755_v13  ;;  %v3756_v33 = vsub.f32 %v3457_v15, %v3467_v35 }
 0x7e2   : > { %v956_v9 = vmul.f32 1.442695, %v3748_v61  ;;  %v958_v11 = vmul.f32 1.442695, %v3749_v10 }
 0x7e3   : > { %v1321_v50 = vmul.f32 1.442695, %v3752_v51  ;;  %v1680_v6 = vmul.f32 1.442695, %v3754_v2  ;;  %v1684_v32 = vmul.f32 1.442695, %v3756_v33 }
 0x7e4   : > { %v644_v2 = vld [vmem:[#allocation4 + $0x8] sm:$0xff] }
 0x7e8   : > { %v3532_v22 = vpop.eup %2738 }
 0x7fe   : > { %655 = vadd.xlane.f32.xlu0 %v654_v5  ;;  %v609_v5 = vmul.f32 1.442695, %v3745_v14 }
 0x802   : > { %658 = vadd.xlane.f32.xlu0 %v657_v23 }
 0x803   : > { %652 = vadd.xlane.f32.xlu1 %v651_v43  ;;  %v607_v43 = vmul.f32 1.442695, %v3744_v1 }
 0x806   : > { %1005 = vadd.xlane.f32.xlu0 %v1004_v28  ;;  %v605_v28 = vmul.f32 1.442695, %v3743_v34 }
 0x807   : > { %661 = vadd.xlane.f32.xlu1 %v660_v12 }
 0x808   : > { %2740 = vpow2.f32 %v605_v28 }
 0x809   : > { %2742 = vpow2.f32 %v607_v43 }
 0x80a   : > { %1008 = vadd.xlane.f32.xlu0 %v1007_v55  ;;  %2744 = vpow2.f32 %v609_v5 }
 0x80b   : > { %1002 = vadd.xlane.f32.xlu1 %v1001_v62  ;;  %2746 = vpow2.f32 %v954_v56 }
 0x80c   : > { %2748 = vpow2.f32 %v952_v60 }
 0x80d   : > { %2750 = vpow2.f32 %v956_v9 }
 0x80e   : > { %1370 = vadd.xlane.f32.xlu0 %v1369_v52  ;;  %2752 = vpow2.f32 %v958_v11 }
 0x80f   : > { %1011 = vadd.xlane.f32.xlu1 %v1010_v48  ;;  %2754 = vpow2.f32 %v1319_v37 }
 0x810   : > { %2756 = vpow2.f32 %v1317_v42 }
 0x811   : > { %2758 = vpow2.f32 %v1321_v50  ;;  %v3757_v50 = vsub.f32 %v3459_v0, %v3470_v25  ;;  %v994_v0 = vld [vmem:[#allocation4 + $0x28] sm:$0xff] }
 0x812   : > { %1373 = vadd.xlane.f32.xlu0 %v1372_v3  ;;  %v3534_v23 = vpop.eup %2740  ;;  %2760 = vpow2.f32 %v1323_v63 }
 0x813   : > { %1367 = vadd.xlane.f32.xlu1 %v1366_v21  ;;  %v3544_v49 = vpop.eup %2742  ;;  %2762 = vpow2.f32 %v1680_v6  ;;  %v1682_v30 = vmul.f32 1.442695, %v3757_v50  ;;  %v648_v6 = vmul.f32 %v3534_v23, %v644_v2 }
 0x814   : > { %v3546_v53 = vpop.eup %2744  ;;  %2764 = vpow2.f32 %v1678_v20  ;;  %v645_v20 = vld [vmem:[#allocation4 + $0x10] sm:$0xff] }
 0x815   : > { %v3553_v27 = vpop.eup %2746  ;;  %2766 = vpow2.f32 %v1684_v32  ;;  %v643_v32 = vld [vmem:[#allocation4] sm:$0xff] }
 0x816   : > { %v3555_v38 = vpop.eup %2748  ;;  %v647_v25 = vmul.f32 %v3532_v22, %v643_v32  ;;  %v675_v32 = vld [vmem:[#allocation5 + $0x18] sm:$0xff] }
 0x817   : > { %1376 = vadd.xlane.f32.xlu1 %v1375_v4  ;;  %v3562_v12 = vpop.eup %2750 }
 0x818   : > { %v3564_v55 = vpop.eup %2752 }
 0x819   : > { %v3571_v62 = vpop.eup %2754 }
 0x81a   : > { %v3573_v52 = vpop.eup %2756 }
 0x81b   : > { %v3580_v48 = vpop.eup %2758 }
 0x81c   : > { %v3586_v3 = vpop.eup %2760 }
 0x81d   : > { %v3589_v21 = vpop.eup %2762 }
 0x81e   : > { %v3592_v24 = vpop.eup %2764 }
 0x81f   : > { %v3595_v44 = vpop.eup %2766 }
 0x828   : > { %678 = vperm.xlu0 %2652, %v3532_v22   ;;  %683 = vperm.xlu1 %2653, %v3534_v23   ;;  %v998_v23 = vmul.f32 %v3553_v27, %v994_v0 }
 0x82c   : > { %693 = vperm.xlu0 %2652, %v3546_v53   ;;  %688 = vperm.xlu1 %2653, %v3544_v49  }
 0x830   : > { %1028 = vperm.xlu0 %2652, %v3555_v38   ;;  %1033 = vperm.xlu1 %2653, %v3553_v27   ;;  %v1359_v27 = vld [vmem:[#allocation4 + $0x48] sm:$0xff] }
 0x834   : > { %1043 = vperm.xlu0 %2652, %v3564_v55   ;;  %1038 = vperm.xlu1 %2653, %v3562_v12  }
 0x838   : > { %1393 = vperm.xlu0 %2652, %v3573_v52   ;;  %1398 = vperm.xlu1 %2653, %v3571_v62  }
 0x83c   : > { %1403 = vperm.xlu0 %2652, %v3580_v48  }
 0x840   : > { %1408 = vperm.xlu0 %2652, %v3586_v3  }
 0x844   : > { %1759 = vperm.xlu0 %2652, %v3589_v21  }
 0x848   : > { %1754 = vperm.xlu0 %2652, %v3592_v24  }
 0x84c   : > { %1769 = vperm.xlu0 %2652, %v3595_v44  }
 0x855   : > { %v1694_v4 = vpop.permute.xlu1 %1693 }
 0x856   : > { %v1707_v35 = vsub.f32 %v3426_v54, %v1694_v4  ;;  %v1689_v15 = vpop.permute.xlu0 %1688  ;;  %v649_v4 = vmul.f32 %v3544_v49, %v645_v20 }
 0x857   : > { %v1706_v26 = vsub.f32 %v3428_v41, %v1689_v15 }
 0x858   : > { %v1712_v40 = vmul.f32 1.442695, %v1707_v35 }
 0x859   : > { %v1710_v34 = vmul.f32 1.442695, %v1706_v26 }
 0x85a   : > { %2768 = vpow2.f32 %v1712_v40  ;;  %v1699_v28 = vpop.permute.xlu1 %1698  ;;  %v1704_v1 = vpop.permute.xlu0 %1703  ;;  %v646_v40 = vld [vmem:[#allocation4 + $0x18] sm:$0xff] }
 0x85b   : > { %2770 = vpow2.f32 %v1710_v34  ;;  %v1708_v43 = vsub.f32 %v3436_v29, %v1699_v28  ;;  %v1709_v14 = vsub.f32 %v3434_v58, %v1704_v1  ;;  %v650_v1 = vmul.f32 %v3546_v53, %v646_v40  ;;  %v1022_v40 = vld [vmem:[#allocation5 + $0x20] sm:$0xff] }
 0x85c   : > { %v1363_v53 = vmul.f32 %v3571_v62, %v1359_v27 }
 0x85d   : > { %v1714_v5 = vmul.f32 1.442695, %v1708_v43  ;;  %v1716_v31 = vmul.f32 1.442695, %v1709_v14  ;;  %v995_v43 = vld [vmem:[#allocation4 + $0x30] sm:$0xff] }
 0x85e   : > { %v2706_v56 = vpop.permute.xlu1 %2705  ;;  %v2711_v59 = vpop.permute.xlu0 %2710  ;;  %v999_v22 = vmul.f32 %v3562_v12, %v995_v43  ;;  %v1360_v12 = vld [vmem:[#allocation4 + $0x50] sm:$0xff] }
 0x85f   : > { %v2708_v60 = vunpack.i.h.bf16 %v2706_v56  ;;  %v2707_v61 = vunpack.i.l.bf16 %v2706_v56  ;;  %v2713_v54 = vunpack.i.h.bf16 %v2711_v59  ;;  %2772 = vpow2.f32 %v1716_v31 }
 0x860   : > { %v2712_v9 = vunpack.i.l.bf16 %v2711_v59  ;;  %2774 = vpow2.f32 %v1714_v5  ;;  %v993_v5 = vld [vmem:[#allocation4 + $0x20] sm:$0xff] }
 0x861   : > { %v2576_v41 = vpack.c.bf16 %v2708_v60, %v2707_v61  ;;  %2776 = vpow2.f32 %v1682_v30  ;;  %v997_v59 = vmul.f32 %v3555_v38, %v993_v5  ;;  %v1364_v38 = vmul.f32 %v3580_v48, %v1360_v12  ;;  %v1024_v5 = vld [vmem:[#allocation5 + $0x30] sm:$0xff] }
 0x862   : > { %v2580_v10 = vpack.c.bf16 %v2713_v54, %v2712_v9  ;;  %v996_v54 = vld [vmem:[#allocation4 + $0x38] sm:$0xff] }
 0x863   : > { %2577 = vmatprep.subr.bf16.mxu0 %v2576_v41 }
 0x864   : > { %v2769_v11 = vpop.eup %2768  ;;  %2579 = vmatpush3.bf16.msra.mxu0 %v2576_v41 }
 0x865   : > { %v2771_v36 = vpop.eup %2770  ;;  %v1730_v29 = vsel %vm582_vm5, %v2769_v11, 0.0  ;;  %2581 = vmatprep.subr.bf16.mxu0 %v2580_v10 }
 0x866   : > { %1731 = vadd.xlane.f32.xlu1 %v1730_v29  ;;  %2498 = vmatprep.mubr.msk.f32.mxu0 %vm582_vm5, %v2771_v36  ;;  %v1727_v58 = vsel %vm582_vm5, %v2771_v36, 0.0  ;;  %v1358_v29 = vld [vmem:[#allocation4 + $0x40] sm:$0xff] }
 0x868   : > { %2583 = vmatpush3.bf16.msra.mxu0 %v2580_v10  ;;  %v1000_v10 = vmul.f32 %v3564_v55, %v996_v54 }
 0x869   : > { %v2773_v37 = vpop.eup %2772 }
 0x86a   : > { %1728 = vadd.xlane.f32.xlu1 %v1727_v58  ;;  %v2775_v39 = vpop.eup %2774  ;;  %v1736_v42 = vsel %vm582_vm5, %v2773_v37, 0.0 }
 0x86b   : > { %2499 = vmatmul.mubr.msk.f32.vlgmr.msra.gmra.mrb[12].mxu0 %vm582_vm5, %v2769_v11  ;;  %v1733_v51 = vsel %vm582_vm5, %v2775_v39, 0.0  ;;  %v3613_v63 = vpop.eup %2776 }
 0x86c   : > { %2501 = vmatprep.mubr.msk.f32.mxu0 %vm582_vm5, %v2775_v39  ;;  %v1362_v39 = vmul.f32 %v3573_v52, %v1358_v29 }
 0x86e   : > { %1737 = vadd.xlane.f32.xlu1 %v1736_v42 }
 0x86f   : > { %2502 = vmatmul.mubr.msk.f32.gmra.mrb[14].mxu0 %vm582_vm5, %v2773_v37 }
 0x872   : > { %1734 = vadd.xlane.f32.xlu1 %v1733_v51  ;;  %v1361_v51 = vld [vmem:[#allocation4 + $0x58] sm:$0xff] }
 0x873   : > { %v1365_v55 = vmul.f32 %v3586_v3, %v1361_v51 }
 0x883   : > { %1764 = vperm.xlu1 %2653, %v3613_v63  }
 0x88b   : > { %v656_v13 = vpop.xlane.xlu0 %655 }
 0x88c   : > { %v664_v33 = vadd.f32 %v656_v13, %v648_v6  ;;  %v672_v6 = vld [vmem:[#allocation5] sm:$0xff]  ;;  %v673_v13 = vld [vmem:[#allocation5 + $0x8] sm:$0xff] }
 0x88e   : > { %669 = vst.msk [vmem:[#allocation4 + $0x8] sm:$0xff] %vm667_vm6, %v664_v33 }
 0x88f   : > { %v659_v35 = vpop.xlane.xlu0 %658 }
 0x890   : > { %v665_v15 = vadd.f32 %v659_v35, %v649_v4  ;;  %v653_v26 = vpop.xlane.xlu1 %652  ;;  %v674_v35 = vld [vmem:[#allocation5 + $0x10] sm:$0xff] }
 0x891   : > { %v663_v34 = vadd.f32 %v653_v26, %v647_v25 }
 0x892   : > { %670 = vst.msk [vmem:[#allocation4 + $0x10] sm:$0xff] %vm667_vm6, %v665_v15 }
 0x893   : > { %668 = vst.msk [vmem:[#allocation4] sm:$0xff] %vm667_vm6, %v663_v34  ;;  %v1006_v28 = vpop.xlane.xlu0 %1005 }
 0x894   : > { %v1014_v14 = vadd.f32 %v1006_v28, %v998_v23  ;;  %v662_v49 = vpop.xlane.xlu1 %661  ;;  %v1023_v23 = vld [vmem:[#allocation5 + $0x28] sm:$0xff] }
 0x895   : > { %v666_v31 = vadd.f32 %v662_v49, %v650_v1 }
 0x896   : > { %1018 = vst.msk [vmem:[#allocation4 + $0x28] sm:$0xff] %vm667_vm6, %v1014_v14  ;;  %v1025_v14 = vld [vmem:[#allocation5 + $0x38] sm:$0xff] }
 0x897   : > { %671 = vst.msk [vmem:[#allocation4 + $0x18] sm:$0xff] %vm667_vm6, %v666_v31  ;;  %v1009_v56 = vpop.xlane.xlu0 %1008 }
 0x898   : > { %v1015_v60 = vadd.f32 %v1009_v56, %v999_v22  ;;  %v1003_v61 = vpop.xlane.xlu1 %1002 }
 0x899   : > { %v1013_v9 = vadd.f32 %v1003_v61, %v997_v59  ;;  %v1387_v59 = vld [vmem:[#allocation5 + $0x40] sm:$0xff] }
 0x89a   : > { %1019 = vst.msk [vmem:[#allocation4 + $0x30] sm:$0xff] %vm667_vm6, %v1015_v60  ;;  %v1388_v60 = vld [vmem:[#allocation5 + $0x48] sm:$0xff] }
 0x89b   : > { %1017 = vst.msk [vmem:[#allocation4 + $0x20] sm:$0xff] %vm667_vm6, %v1013_v9  ;;  %v1371_v41 = vpop.xlane.xlu0 %1370 }
 0x89c   : > { %v1379_v11 = vadd.f32 %v1371_v41, %v1363_v53  ;;  %v1012_v36 = vpop.xlane.xlu1 %1011  ;;  %v1389_v53 = vld [vmem:[#allocation5 + $0x50] sm:$0xff] }
 0x89d   : > { %v1016_v58 = vadd.f32 %v1012_v36, %v1000_v10 }
 0x89e   : > { %1383 = vst.msk [vmem:[#allocation4 + $0x48] sm:$0xff] %vm667_vm6, %v1379_v11  ;;  %v3758_v11 = vld [vmem:[#allocation9_spill] sm:$0xff] }
 0x89f   : > { %1020 = vst.msk [vmem:[#allocation4 + $0x38] sm:$0xff] %vm667_vm6, %v1016_v58  ;;  %v1374_v37 = vpop.xlane.xlu0 %1373 }
 0x8a0   : > { %v1380_v62 = vadd.f32 %v1374_v37, %v1364_v38  ;;  %v1368_v42 = vpop.xlane.xlu1 %1367  ;;  %v3759_v38 = vld [vmem:[#allocation8_spill] sm:$0xff] }
 0x8a1   : > { %v1378_v50 = vadd.f32 %v1368_v42, %v1362_v39 }
 0x8a2   : > { %1384 = vst.msk [vmem:[#allocation4 + $0x50] sm:$0xff] %vm667_vm6, %v1380_v62  ;;  %v1719_v62 = vld [vmem:[#allocation4 + $0x60] sm:$0xff] }
 0x8a3   : > { %1382 = vst.msk [vmem:[#allocation4 + $0x40] sm:$0xff] %vm667_vm6, %v1378_v50  ;;  %v1723_v51 = vmul.f32 %v3592_v24, %v1719_v62 }
 0x8a4   : > { %v1377_v30 = vpop.xlane.xlu1 %1376 }
 0x8a5   : > { %v1381_v2 = vadd.f32 %v1377_v30, %v1365_v55  ;;  %v1722_v55 = vld [vmem:[#allocation4 + $0x78] sm:$0xff] }
 0x8a7   : > { %1385 = vst.msk [vmem:[#allocation4 + $0x58] sm:$0xff] %vm667_vm6, %v1381_v2  ;;  %v679_v48 = vpop.permute.xlu0 %678  ;;  %v1726_v2 = vmul.f32 %v3595_v44, %v1722_v55 }
 0x8a8   : > { %v696_v20 = vmul.f32 %v679_v48, %v672_v6  ;;  %v684_v33 = vpop.permute.xlu1 %683 }
 0x8a9   : > { %v697_v52 = vmul.f32 %v684_v33, %v673_v13  ;;  %v1721_v13 = vld [vmem:[#allocation4 + $0x70] sm:$0xff] }
 0x8aa   : > { %v797_v4 = vadd.f32 %v3226_v8, %v696_v20 }
 0x8ab   : > { %v798_v25 = vadd.f32 %v3224_v7, %v697_v52  ;;  %v694_v0 = vpop.permute.xlu0 %693 }
 0x8ac   : > { %802 = vst.msk [vmem:[#allocation5] sm:$0xff] %vm801_vm7, %v797_v4  ;;  %v699_v3 = vmul.f32 %v694_v0, %v675_v32  ;;  %v689_v15 = vpop.permute.xlu1 %688  ;;  %v1749_v32 = vld [vmem:[#allocation5 + $0x68] sm:$0xff]  ;;  %v1748_v4 = vld [vmem:[#allocation5 + $0x60] sm:$0xff]  ;;  %v1751_v0 = vld [vmem:[#allocation5 + $0x78] sm:$0xff] }
 0x8ad   : > { %803 = vst.msk [vmem:[#allocation5 + $0x8] sm:$0xff] %vm801_vm7, %v798_v25  ;;  %v698_v26 = vmul.f32 %v689_v15, %v674_v35  ;;  %v1750_v15 = vld [vmem:[#allocation5 + $0x70] sm:$0xff] }
 0x8ae   : > { %v800_v34 = vadd.f32 %v3228_v16, %v699_v3 }
 0x8af   : > { %v799_v28 = vadd.f32 %v3230_v17, %v698_v26  ;;  %v1029_v1 = vpop.permute.xlu0 %1028 }
 0x8b0   : > { %805 = vst.msk [vmem:[#allocation5 + $0x18] sm:$0xff] %vm801_vm7, %v800_v34  ;;  %v1046_v8 = vmul.f32 %v1029_v1, %v1022_v40  ;;  %v1034_v43 = vpop.permute.xlu1 %1033 }
 0x8b1   : > { %804 = vst.msk [vmem:[#allocation5 + $0x10] sm:$0xff] %vm801_vm7, %v799_v28  ;;  %v1047_v7 = vmul.f32 %v1034_v43, %v1023_v23 }
 0x8b2   : > { %v1163_v49 = vadd.f32 %v3326_v57, %v1046_v8 }
 0x8b3   : > { %v1164_v31 = vadd.f32 %v3324_v47, %v1047_v7  ;;  %v1044_v22 = vpop.permute.xlu0 %1043 }
 0x8b4   : > { %1167 = vst.msk [vmem:[#allocation5 + $0x20] sm:$0xff] %vm801_vm7, %v1163_v49  ;;  %v1049_v16 = vmul.f32 %v1044_v22, %v1025_v14  ;;  %v1039_v56 = vpop.permute.xlu1 %1038  ;;  %v1943_v14 = vld [vmem:[#allocation4 + $0x30] sm:$0xff] (!%p2325_p10)  ;;  %v1941_v49 = vld [vmem:[#allocation4 + $0x20] sm:$0xff] (!%p2325_p10)  ;;  %v1942_v22 = vld [vmem:[#allocation4 + $0x28] sm:$0xff] (!%p2325_p10) }
 0x8b5   : > { %1168 = vst.msk [vmem:[#allocation5 + $0x28] sm:$0xff] %vm801_vm7, %v1164_v31  ;;  %v1048_v17 = vmul.f32 %v1039_v56, %v1024_v5  ;;  %v1944_v5 = vld [vmem:[#allocation4 + $0x38] sm:$0xff] (!%p2325_p10)  ;;  %v2876_v31 = vmov (!%p2325_p10), 0   ;;  %2780 = vrcp.f32 (!%p2325_p10), %v1943_v14  ;;  %v1977_v56 = vld [vmem:[#allocation4 + $0x40] sm:$0xff] (!%p2325_p10) }
 0x8b6   : > { %v1166_v27 = vadd.f32 %v3328_v18, %v1049_v16  ;;  %2779 = vset.pattern.permute.xlu1 (!%p2325_p10), %v2876_v31  ;;  %2778 = vset.pattern.permute.xlu0 (!%p2325_p10), %v2876_v31  ;;  %2782 = vrcp.f32 (!%p2325_p10), %v1941_v49  ;;  %v1978_v16 = vld [vmem:[#allocation4 + $0x48] sm:$0xff] (!%p2325_p10) }
 0x8b7   : > { %v1165_v61 = vadd.f32 %v3330_v19, %v1048_v17  ;;  %v1394_v54 = vpop.permute.xlu0 %1393  ;;  %v1390_v19 = vld [vmem:[#allocation5 + $0x58] sm:$0xff]  ;;  %2784 = vrcp.f32 (!%p2325_p10), %v1944_v5 }
 0x8b8   : > { %1170 = vst.msk [vmem:[#allocation5 + $0x38] sm:$0xff] %vm801_vm7, %v1166_v27  ;;  %v1411_v57 = vmul.f32 %v1394_v54, %v1387_v59  ;;  %v1399_v9 = vpop.permute.xlu1 %1398  ;;  %2786 = vrcp.f32 (!%p2325_p10), %v1942_v22  ;;  %v1980_v17 = vld [vmem:[#allocation4 + $0x58] sm:$0xff] (!%p2325_p10)  ;;  %v1979_v59 = vld [vmem:[#allocation4 + $0x50] sm:$0xff] (!%p2325_p10) }
 0x8b9   : > { %1169 = vst.msk [vmem:[#allocation5 + $0x30] sm:$0xff] %vm801_vm7, %v1165_v61  ;;  %v1412_v47 = vmul.f32 %v1399_v9, %v1388_v60  ;;  %2788 = vrcp.f32 (!%p2325_p10), %v1978_v16 }
 0x8ba   : > { %v1524_v41 = vadd.f32 %v3420_v46, %v1411_v57  ;;  %v1720_v46 = vld [vmem:[#allocation4 + $0x68] sm:$0xff]  ;;  %2790 = vrcp.f32 (!%p2325_p10), %v1977_v56 }
 0x8bb   : > { %v1525_v10 = vadd.f32 %v3418_v45, %v1412_v47  ;;  %v1404_v12 = vpop.permute.xlu0 %1403  ;;  %v1724_v45 = vmul.f32 %v3589_v21, %v1720_v46  ;;  %v1725_v21 = vmul.f32 %v3613_v63, %v1721_v13  ;;  %2792 = vrcp.f32 (!%p2325_p10), %v1980_v17 }
 0x8bc   : > { %1528 = vst.msk [vmem:[#allocation5 + $0x40] sm:$0xff] %vm801_vm7, %v1524_v41  ;;  %v1413_v18 = vmul.f32 %v1404_v12, %v1389_v53  ;;  %2794 = vrcp.f32 (!%p2325_p10), %v1979_v59  ;;  %v1906_v12 = vld [vmem:[#allocation4 + $0x8] sm:$0xff] (!%p2325_p10) }
 0x8bd   : > { %1529 = vst.msk [vmem:[#allocation5 + $0x48] sm:$0xff] %vm801_vm7, %v1525_v10 }
 0x8be   : > { %v1526_v36 = vadd.f32 %v3758_v11, %v1413_v18 }
 0x8bf   : > { %v1409_v29 = vpop.permute.xlu0 %1408  ;;  %v2781_v27 = vpop.eup (!%p2325_p10), %2780 }
 0x8c0   : > { %1530 = vst.msk [vmem:[#allocation5 + $0x50] sm:$0xff] %vm801_vm7, %v1526_v36  ;;  %v1414_v58 = vmul.f32 %v1409_v29, %v1390_v19  ;;  %v2783_v60 = vpop.eup (!%p2325_p10), %2782  ;;  %1961 = vperm.xlu1 (!%p2325_p10), %2779, %v2781_v27   ;;  %v1905_v19 = vld [vmem:[#allocation4] sm:$0xff] (!%p2325_p10)  ;;  %v1908_v36 = vld [vmem:[#allocation4 + $0x18] sm:$0xff] (!%p2325_p10)  ;;  %v1939_v55 = vld [vmem:[#allocation5 + $0x30] sm:$0xff] (!%p2325_p10) }
 0x8c1   : > { %v2785_v54 = vpop.eup (!%p2325_p10), %2784  ;;  %1951 = vperm.xlu0 (!%p2325_p10), %2778, %v2783_v60  }
 0x8c2   : > { %v1527_v37 = vadd.f32 %v3759_v38, %v1414_v58  ;;  %v2787_v9 = vpop.eup (!%p2325_p10), %2786  ;;  %v1907_v58 = vld [vmem:[#allocation4 + $0x10] sm:$0xff] (!%p2325_p10) }
 0x8c3   : > { %v1760_v52 = vpop.permute.xlu0 %1759  ;;  %v2789_v53 = vpop.eup (!%p2325_p10), %2788 }
 0x8c4   : > { %1531 = vst.msk [vmem:[#allocation5 + $0x58] sm:$0xff] %vm801_vm7, %v1527_v37  ;;  %v1773_v35 = vmul.f32 %v1760_v52, %v1749_v32  ;;  %1966 = vperm.xlu1 (!%p2325_p10), %2779, %v2785_v54   ;;  %v2791_v10 = vpop.eup (!%p2325_p10), %2790  ;;  %v1973_v52 = vld [vmem:[#allocation5 + $0x40] sm:$0xff] (!%p2325_p10) }
 0x8c5   : > { %1956 = vperm.xlu0 (!%p2325_p10), %2778, %v2787_v9   ;;  %v2793_v18 = vpop.eup (!%p2325_p10), %2792  ;;  %v1901_v9 = vld [vmem:[#allocation5] sm:$0xff] (!%p2325_p10) }
 0x8c6   : > { %v2795_v11 = vpop.eup (!%p2325_p10), %2794 }
 0x8c7   : > { %v1755_v24 = vpop.permute.xlu0 %1754 }
 0x8c8   : > { %v1772_v25 = vmul.f32 %v1755_v24, %v1748_v4  ;;  %1992 = vperm.xlu1 (!%p2325_p10), %2779, %v2789_v53  }
 0x8c9   : > { %1987 = vperm.xlu0 (!%p2325_p10), %2778, %v2791_v10   ;;  %v1902_v10 = vld [vmem:[#allocation5 + $0x8] sm:$0xff] (!%p2325_p10) }
 0x8cb   : > { %v1770_v3 = vpop.permute.xlu0 %1769 }
 0x8cc   : > { %v1775_v28 = vmul.f32 %v1770_v3, %v1751_v0  ;;  %2002 = vperm.xlu1 (!%p2325_p10), %2779, %v2793_v18   ;;  %v1975_v0 = vld [vmem:[#allocation5 + $0x50] sm:$0xff] (!%p2325_p10)  ;;  %v3760_v18 = vld [vmem:[#allocation7_spill] sm:$0xff] (!%p2325_p10) }
 0x8cd   : > { %1997 = vperm.xlu0 (!%p2325_p10), %2778, %v2795_v11   ;;  %v3762_v11 = vld [vmem:[#allocation6_spill] sm:$0xff] (!%p2325_p10) }
 0x8f3   : > { %v1732_v39 = vpop.xlane.xlu1 %1731 }
 0x8f4   : > { %v1740_v42 = vadd.f32 %v1732_v39, %v1724_v45 }
 0x8f6   : > { %1744 = vst.msk [vmem:[#allocation4 + $0x68] sm:$0xff] %vm667_vm6, %v1740_v42 }
 0x8f7   : > { %v1729_v50 = vpop.xlane.xlu1 %1728 }
 0x8f8   : > { %v1739_v30 = vadd.f32 %v1729_v50, %v1723_v51  ;;  %v1937_v51 = vld [vmem:[#allocation5 + $0x20] sm:$0xff] (!%p2325_p10) }
 0x8fa   : > { %1743 = vst.msk [vmem:[#allocation4 + $0x60] sm:$0xff] %vm667_vm6, %v1739_v30 }
 0x8fb   : > { %v1738_v6 = vpop.xlane.xlu1 %1737 }
 0x8fc   : > { %v1742_v48 = vadd.f32 %v1738_v6, %v1726_v2  ;;  %v1938_v6 = vld [vmem:[#allocation5 + $0x28] sm:$0xff] (!%p2325_p10) }
 0x8fd   : > { %v2014_v61 = vld [vmem:[#allocation4 + $0x68] sm:$0xff] (!%p2325_p10) }
 0x8fe   : > { %1746 = vst.msk [vmem:[#allocation4 + $0x78] sm:$0xff] %vm667_vm6, %v1742_v48  ;;  %2796 = vrcp.f32 (!%p2325_p10), %v2014_v61 }
 0x8ff   : > { %v1735_v20 = vpop.xlane.xlu1 %1734 }
 0x900   : > { %v1741_v33 = vadd.f32 %v1735_v20, %v1725_v21 }
 0x901   : > { %v2013_v57 = vld [vmem:[#allocation4 + $0x60] sm:$0xff] (!%p2325_p10) }
 0x902   : > { %1745 = vst.msk [vmem:[#allocation4 + $0x70] sm:$0xff] %vm667_vm6, %v1741_v33  ;;  %2798 = vrcp.f32 (!%p2325_p10), %v2013_v57  ;;  %v1940_v33 = vld [vmem:[#allocation5 + $0x38] sm:$0xff] (!%p2325_p10) }
 0x903   : > { %v1765_v26 = vpop.permute.xlu1 %1764 }
 0x904   : > { %v1774_v63 = vmul.f32 %v1765_v26, %v1750_v15 }
 0x905   : > { %v2016_v47 = vld [vmem:[#allocation4 + $0x78] sm:$0xff] (!%p2325_p10) }
 0x906   : > { %2800 = vrcp.f32 (!%p2325_p10), %v2016_v47 }
 0x908   : > { %v2797_v29 = vpop.eup (!%p2325_p10), %2796 }
 0x909   : > { %v2015_v41 = vld [vmem:[#allocation4 + $0x70] sm:$0xff] (!%p2325_p10)  ;;  %2028 = vperm.xlu1 (!%p2325_p10), %2779, %v2797_v29  }
 0x90a   : > { %2802 = vrcp.f32 (!%p2325_p10), %v2015_v41 }
 0x90b   : > { %2804 = vrcp.f32 (!%p2325_p10), %v1906_v12  ;;  %v1903_v12 = vld [vmem:[#allocation5 + $0x10] sm:$0xff] (!%p2325_p10) }
 0x90c   : > { %2806 = vrcp.f32 (!%p2325_p10), %v1905_v19  ;;  %v2799_v38 = vpop.eup (!%p2325_p10), %2798  ;;  %v3761_v19 = vsub.s32 (!%p2325_p10), 2, %v3760_v18 }
 0x90d   : > { %2808 = vrcp.f32 (!%p2325_p10), %v1908_v36  ;;  %2023 = vperm.xlu0 (!%p2325_p10), %2778, %v2799_v38  }
 0x90e   : > { %2810 = vrcp.f32 (!%p2325_p10), %v1907_v58  ;;  %v2109_v36 = vrot.slane (!%p2325_p10), %v3762_v11, %v3761_v19 }
 0x910   : > { %v2801_v37 = vpop.eup (!%p2325_p10), %2800 }
 0x911   : > { %2038 = vperm.xlu1 (!%p2325_p10), %2779, %v2801_v37   ;;  %v3763_v37 = vsub.s32 (!%p2325_p10), 3, %v3760_v18 }
 0x914   : > { %v2803_v46 = vpop.eup (!%p2325_p10), %2802 }
 0x915   : > { %v2805_v45 = vpop.eup (!%p2325_p10), %2804  ;;  %2033 = vperm.xlu0 (!%p2325_p10), %2778, %v2803_v46   ;;  %v2117_v46 = vrot.slane (!%p2325_p10), %v3762_v11, %v3763_v37 }
 0x916   : > { %v2807_v39 = vpop.eup (!%p2325_p10), %2806  ;;  %1920 = vperm.xlu1 (!%p2325_p10), %2779, %v2805_v45  }
 0x917   : > { %v2809_v62 = vpop.eup (!%p2325_p10), %2808 }
 0x918   : > { %v2811_v42 = vpop.eup (!%p2325_p10), %2810 }
 0x919   : > { %1915 = vperm.xlu0 (!%p2325_p10), %2778, %v2807_v39  }
 0x91a   : > { %1930 = vperm.xlu1 (!%p2325_p10), %2779, %v2809_v62  }
 0x91d   : > { %1925 = vperm.xlu0 (!%p2325_p10), %2778, %v2811_v42  }
 0x93e   : > { %v2500_v44 = vpop.f32.mrb[12].mxu0 }
 0x93f   : > { %v1886_v40 = vadd.f32 %v2500_v44, %v1773_v35  ;;  %v1866_v34 = vpop.f32.mrb[13].mxu0  ;;  %v1962_v50 = vpop.permute.xlu1 (!%p2325_p10), %1961 }
 0x940   : > { %v1885_v23 = vadd.f32 %v1866_v34, %v1772_v25  ;;  %1900 = sbr.rel (%p2325_p10) target bundleno = 2576 (0xa10), region = 48  ;;  %v1952_v30 = vpop.permute.xlu0 (!%p2325_p10), %1951  ;;  %v1971_v13 = vmul.f32 (!%p2325_p10), %v1962_v50, %v1939_v55  ;;  %v1974_v25 = vld [vmem:[#allocation5 + $0x48] sm:$0xff] (!%p2325_p10) }
 0x941   : > { %1890 = vst.msk [vmem:[#allocation5 + $0x68] sm:$0xff] %vm801_vm7, %v1886_v40  ;;  %v1969_v2 = vmul.f32 (!%p2325_p10), %v1952_v30, %v1937_v51  ;;  %v1976_v40 = vld [vmem:[#allocation5 + $0x58] sm:$0xff] (!%p2325_p10) }
 0x942   : > { %1889 = vst.msk [vmem:[#allocation5 + $0x60] sm:$0xff] %vm801_vm7, %v1885_v23  ;;  %v2503_v1 = vpop.f32.mrb[14].mxu0  ;;  %v1904_v51 = vld [vmem:[#allocation5 + $0x18] sm:$0xff] (!%p2325_p10) }
 0x943   : > { %v1888_v8 = vadd.f32 %v2503_v1, %v1775_v28  ;;  %v1876_v43 = vpop.f32.mrb[15].mxu0  ;;  %2049 = vrot.lane.b32.xlu0 (!%p2325_p10), %v1969_v2, %s2877_s18  ;;  %v1967_v48 = vpop.permute.xlu1 (!%p2325_p10), %1966 }
 0x944   : > { %v1887_v7 = vadd.f32 %v1876_v43, %v1774_v63  ;;  %v1957_v21 = vpop.permute.xlu0 (!%p2325_p10), %1956  ;;  %v1972_v4 = vmul.f32 (!%p2325_p10), %v1967_v48, %v1940_v33 }
 0x945   : > { %1892 = vst.msk [vmem:[#allocation5 + $0x78] sm:$0xff] %vm801_vm7, %v1888_v8  ;;  %v1970_v20 = vmul.f32 (!%p2325_p10), %v1957_v21, %v1938_v6 }
 0x946   : > { %1891 = vst.msk [vmem:[#allocation5 + $0x70] sm:$0xff] %vm801_vm7, %v1887_v7 }
 0x947   : > { %2051 = vrot.lane.b32.xlu1 %v1970_v20, %s2877_s18  ;;  %2053 = vrot.lane.b32.xlu0 %v1971_v13, %s2877_s18  ;;  %v1993_v24 = vpop.permute.xlu1 %1992 }
 0x948   : > { %v1988_v32 = vpop.permute.xlu0 %1987  ;;  %v2006_v15 = vmul.f32 %v1993_v24, %v1974_v25  ;;  %v2010_v8 = vld [vmem:[#allocation5 + $0x68] sm:$0xff] }
 0x949   : > { %v2005_v35 = vmul.f32 %v1988_v32, %v1973_v52  ;;  %v2009_v34 = vld [vmem:[#allocation5 + $0x60] sm:$0xff] }
 0x94b   : > { %2055 = vrot.lane.b32.xlu1 %v1972_v4, %s2877_s18  ;;  %2065 = vrot.lane.b32.xlu0 %v2005_v35, %s2878_s14  ;;  %v2003_v3 = vpop.permute.xlu1 %2002 }
 0x94c   : > { %v1998_v44 = vpop.permute.xlu0 %1997  ;;  %v2008_v63 = vmul.f32 %v2003_v3, %v1976_v40  ;;  %v2012_v5 = vld [vmem:[#allocation5 + $0x78] sm:$0xff] }
 0x94d   : > { %v2007_v26 = vmul.f32 %v1998_v44, %v1975_v0  ;;  %v2011_v43 = vld [vmem:[#allocation5 + $0x70] sm:$0xff] }
 0x94f   : > { %2067 = vrot.lane.b32.xlu1 %v2006_v15, %s2878_s14  ;;  %2069 = vrot.lane.b32.xlu0 %v2007_v26, %s2878_s14 }
 0x953   : > { %2071 = vrot.lane.b32.xlu1 %v2008_v63, %s2878_s14 }
 0x988   : > { %v2029_v23 = vpop.permute.xlu1 %2028 }
 0x989   : > { %v2042_v14 = vmul.f32 %v2029_v23, %v2010_v8 }
 0x98b   : > { %2083 = vrot.lane.b32.xlu1 %v2042_v14, %s2879_s15 }
 0x98c   : > { %v2024_v28 = vpop.permute.xlu0 %2023 }
 0x98d   : > { %v2041_v1 = vmul.f32 %v2024_v28, %v2009_v34 }
 0x98f   : > { %2081 = vrot.lane.b32.xlu0 %v2041_v1, %s2879_s15 }
 0x990   : > { %v2039_v31 = vpop.permute.xlu1 %2038 }
 0x991   : > { %v2044_v22 = vmul.f32 %v2039_v31, %v2012_v5 }
 0x993   : > { %2087 = vrot.lane.b32.xlu1 %v2044_v22, %s2879_s15 }
 0x994   : > { %v2034_v7 = vpop.permute.xlu0 %2033 }
 0x995   : > { %v2043_v49 = vmul.f32 %v2034_v7, %v2011_v43  ;;  %v1921_v56 = vpop.permute.xlu1 %1920 }
 0x996   : > { %v1934_v39 = vmul.f32 %v1921_v56, %v1902_v10 }
 0x997   : > { %2085 = vrot.lane.b32.xlu0 %v2043_v49, %s2879_s15 }
 0x998   : > { %v1916_v16 = vpop.permute.xlu0 %1915 }
 0x999   : > { %v1931_v59 = vpop.permute.xlu1 %1930  ;;  %v1933_v41 = vmul.f32 %v1916_v16, %v1901_v9 }
 0x99a   : > { %v1936_v20 = vmul.f32 %v1931_v59, %v1904_v51 }
 0x99c   : > { %v1926_v17 = vpop.permute.xlu0 %1925 }
 0x99d   : > { %v1935_v62 = vmul.f32 %v1926_v17, %v1903_v12 }
 0x9b5   : > { %v2050_v27 = vpop.permute.xlu0 %2049 }
 0x9b6   : > { %v2093_v29 = vsel %vm801_vm7, %v1933_v41, %v2050_v27 }
 0x9b9   : > { %v2052_v60 = vpop.permute.xlu1 %2051  ;;  %v2054_v61 = vpop.permute.xlu0 %2053 }
 0x9ba   : > { %v2094_v55 = vsel %vm801_vm7, %v1934_v39, %v2052_v60  ;;  %v2095_v30 = vsel %vm801_vm7, %v1935_v62, %v2054_v61 }
 0x9bd   : > { %v2056_v54 = vpop.permute.xlu1 %2055  ;;  %v2066_v57 = vpop.permute.xlu0 %2065 }
 0x9be   : > { %v2097_v58 = vsel %vm468_vm3, %v2093_v29, %v2066_v57  ;;  %v2096_v4 = vsel %vm801_vm7, %v1936_v20, %v2056_v54 }
 0x9c1   : > { %v2068_v47 = vpop.permute.xlu1 %2067  ;;  %v2070_v53 = vpop.permute.xlu0 %2069 }
 0x9c2   : > { %v2098_v2 = vsel %vm468_vm3, %v2094_v55, %v2068_v47  ;;  %v2099_v6 = vsel %vm468_vm3, %v2095_v30, %v2070_v53 }
 0x9c5   : > { %v2072_v38 = vpop.permute.xlu1 %2071 }
 0x9c6   : > { %v2100_v35 = vsel %vm468_vm3, %v2096_v4, %v2072_v38 }
 0x9fd   : > { %v2084_v48 = vpop.permute.xlu1 %2083 }
 0x9fe   : > { %v2103_v33 = vsel %vm2101_vm8, %v2098_v2, %v2084_v48 }
 0x9ff   : > { %v2111_v24 = vmul.f32 %v2109_v36, %v2103_v33 }
 0xa01   : > { %v2082_v45 = vpop.permute.xlu0 %2081  ;;  %v2119_v25 = vadd.f32 %v2117_v46, %v2111_v24 }
 0xa02   : > { %v2102_v42 = vsel %vm2101_vm8, %v2097_v58, %v2082_v45 }
 0xa03   : > { %v2110_v50 = vmul.f32 %v2109_v36, %v2102_v42  ;;  %2124 = vst.msk [vmem:[%s2973_s17 + $0x8] sm:$0xff] %vm2122_vm9, %v2119_v25 }
 0xa05   : > { %v2118_v13 = vadd.f32 %v2117_v46, %v2110_v50  ;;  %v2088_v3 = vpop.permute.xlu1 %2087 }
 0xa06   : > { %v2105_v44 = vsel %vm2101_vm8, %v2100_v35, %v2088_v3 }
 0xa07   : > { %2123 = vst.msk [vmem:[%s2973_s17] sm:$0xff] %vm2122_vm9, %v2118_v13  ;;  %v2113_v15 = vmul.f32 %v2109_v36, %v2105_v44 }
 0xa09   : > { %v2086_v21 = vpop.permute.xlu0 %2085  ;;  %v2121_v26 = vadd.f32 %v2117_v46, %v2113_v15 }
 0xa0a   : > { %v2104_v52 = vsel %vm2101_vm8, %v2099_v6, %v2086_v21 }
 0xa0b   : > { %v2112_v32 = vmul.f32 %v2109_v36, %v2104_v52  ;;  %2126 = vst.msk [vmem:[%s2973_s17 + $0x18] sm:$0xff] %vm2122_vm9, %v2121_v26 }
 0xa0d   : > { %v2120_v0 = vadd.f32 %v2117_v46, %v2112_v32 }
 0xa0f   : > { %2125 = vst.msk [vmem:[%s2973_s17 + $0x10] sm:$0xff] %vm2122_vm9, %v2120_v0 }
 0xa10 PF: > { %s15_s24 = sadd.s32 1, %s2866_s24   ;;  %s3764_s18 = smov %s2854_s21 }
 0xa11   : > { %p12_p11 = scmp.ge.s32.totalorder %s15_s24, 10   ;;  %s3765_s19 = smov %s2858_s22 }
 0xa12   : > { %s3766_s20 = smov %s2862_s23  ;;  %s3767_s21 = smov %s3771_s25 }
 0xa13   : > { %s3768_s22 = smov %s3775_s26  ;;  %s3769_s23 = smov %s3779_s27 }
 0xa14   :  { %14 = sbr.rel (!%p12_p11) target bundleno = 4 (0x4), region = 93 }

</bundles_post_ra>
